<compile_context>
chip_gen: v5e
topology: v5e:2x2
jax: 0.10.0
libtpu: 0.0.40
codegen_flags: <defaults>
</compile_context>

<pallas_src>
import functools

import jax
import jax.numpy as jnp
from jax import lax
from jax.experimental import pallas as pl
from jax.experimental.pallas import tpu as pltpu

_LN_EPS = 1e-6
_NEG_INF = -1e9


def _default_vmem_limit():
    # ~3/4 of physical VMEM: ~96 MiB on v5e/v6e (128 MiB), ~48 MiB on v7x (64 MiB).
    try:
        cap = int(pltpu.get_tpu_info().vmem_capacity_bytes)
        return max(48 * 1024 * 1024, min(3 * cap // 4, 100 * 1024 * 1024))
    except Exception:
        return 64 * 1024 * 1024


_VMEM_LIMIT = _default_vmem_limit()


def _round_up(x, m):
    return ((x + m - 1) // m) * m


def _tile_for(dim, preferred, align):
    """Pick (tile, padded_dim) with tile | padded_dim and TPU-layout-legal tiles.

    Never falls back to an unaligned full dimension for large dims; callers pad
    the array to `padded_dim` and slice the result instead.
    """
    if dim <= preferred:
        if dim <= align:
            return dim, dim                  # full-(small)-dim block is always legal
        pad = _round_up(dim, align)
        return pad, pad                      # one aligned tile
    tile = max(align, (preferred // align) * align)
    return tile, _round_up(dim, tile)


def _pad_axis(x, axis, new_size, value=0.0):
    if x.shape[axis] == new_size:
        return x
    widths = [(0, 0)] * x.ndim
    widths[axis] = (0, new_size - x.shape[axis])
    return jnp.pad(x, widths, constant_values=value)


# ----------------------------------------------------------------------------
# Kernel 1: fused LayerNorm + matmul (+ bias, optional GELU epilogue)
#   grid = (M//tm, N//tn); K kept whole so the LN (full-row reduction) fuses.
# ----------------------------------------------------------------------------
def _ln_matmul_kernel(x_ref, g_ref, b_ref, w_ref, bias_ref, o_ref,
                      *, activation, eps):
    x = x_ref[...].astype(jnp.float32)                      # (tm, K)
    mu = jnp.mean(x, axis=-1, keepdims=True)
    xc = x - mu
    var = jnp.mean(xc * xc, axis=-1, keepdims=True)
    xn = g_ref[...] * xc * lax.rsqrt(var + eps) + b_ref[...]
    y = jnp.dot(xn.astype(jnp.bfloat16), w_ref[...],        # bf16 MXU, f32 acc
                preferred_element_type=jnp.float32) + bias_ref[...]
    if activation == "gelu":
        y = jax.nn.gelu(y)
    o_ref[...] = y.astype(o_ref.dtype)


def pallas_ln_matmul(x, gamma, beta, w, bias, *, activation=None,
                     tm=512, tn=256):
    m, k = x.shape
    n = w.shape[1]
    tm, m_pad = _tile_for(m, tm, 8)
    tn, n_pad = _tile_for(n, tn, 128)
    x_p = _pad_axis(x, 0, m_pad)
    w_p = _pad_axis(w, 1, n_pad)
    bias_p = _pad_axis(bias.reshape(1, n), 1, n_pad)
    out = pl.pallas_call(
        functools.partial(_ln_matmul_kernel, activation=activation,
                          eps=_LN_EPS),
        grid=(m_pad // tm, n_pad // tn),
        in_specs=[
            pl.BlockSpec((tm, k), lambda i, j: (i, 0)),
            pl.BlockSpec((1, k), lambda i, j: (0, 0)),
            pl.BlockSpec((1, k), lambda i, j: (0, 0)),
            pl.BlockSpec((k, tn), lambda i, j: (0, j)),
            pl.BlockSpec((1, tn), lambda i, j: (0, j)),
        ],
        out_specs=pl.BlockSpec((tm, tn), lambda i, j: (i, j)),
        out_shape=jax.ShapeDtypeStruct((m_pad, n_pad), jnp.bfloat16),
        compiler_params=pltpu.CompilerParams(
            dimension_semantics=("parallel", "parallel"),
            vmem_limit_bytes=_VMEM_LIMIT),
    )(x_p, gamma.reshape(1, k), beta.reshape(1, k), w_p, bias_p)
    return out[:m, :n] if (m_pad != m or n_pad != n) else out


# ----------------------------------------------------------------------------
# Kernel 2: K-tiled matmul with f32 accumulator + bias + residual epilogue
# ----------------------------------------------------------------------------
def _matmul_res_kernel(x_ref, w_ref, bias_ref, res_ref, o_ref, acc_ref):
    k = pl.program_id(2)

    @pl.when(k == 0)
    def _():
        acc_ref[...] = jnp.zeros_like(acc_ref)

    acc_ref[...] += jnp.dot(x_ref[...], w_ref[...],
                            preferred_element_type=jnp.float32)

    @pl.when(k == pl.num_programs(2) - 1)
    def _():
        y = acc_ref[...] + bias_ref[...] + res_ref[...].astype(jnp.float32)
        o_ref[...] = y.astype(o_ref.dtype)


def pallas_matmul_residual(x, w, bias, res, *, tm=512, tn=256, tk=512):
    m, kdim = x.shape
    n = w.shape[1]
    tm, m_pad = _tile_for(m, tm, 8)
    tn, n_pad = _tile_for(n, tn, 128)
    tk, k_pad = _tile_for(kdim, tk, 128)
    x_p = _pad_axis(_pad_axis(x, 0, m_pad), 1, k_pad)
    w_p = _pad_axis(_pad_axis(w, 0, k_pad), 1, n_pad)
    bias_p = _pad_axis(bias.reshape(1, n), 1, n_pad)
    res_p = _pad_axis(_pad_axis(res, 0, m_pad), 1, n_pad)
    out = pl.pallas_call(
        _matmul_res_kernel,
        grid=(m_pad // tm, n_pad // tn, k_pad // tk),
        in_specs=[
            pl.BlockSpec((tm, tk), lambda i, j, k: (i, k)),
            pl.BlockSpec((tk, tn), lambda i, j, k: (k, j)),
            pl.BlockSpec((1, tn), lambda i, j, k: (0, j)),
            pl.BlockSpec((tm, tn), lambda i, j, k: (i, j)),
        ],
        out_specs=pl.BlockSpec((tm, tn), lambda i, j, k: (i, j)),
        out_shape=jax.ShapeDtypeStruct((m_pad, n_pad), jnp.bfloat16),
        scratch_shapes=[pltpu.VMEM((tm, tn), jnp.float32)],
        compiler_params=pltpu.CompilerParams(
            dimension_semantics=("parallel", "parallel", "arbitrary"),
            vmem_limit_bytes=_VMEM_LIMIT),
    )(x_p, w_p, bias_p, res_p)
    return out[:m, :n] if (m_pad != m or n_pad != n) else out


# ----------------------------------------------------------------------------
# Kernel 3: flash attention directly on the fused (B, S, 3H) QKV activation.
#   grid = (B, S//t, S//t); all heads handled per grid step (static unroll),
#   output written lane-dense as (B, S, H) so no XLA head merge is needed.
# ----------------------------------------------------------------------------
def _flash_attn_kernel(q_ref, k_ref, v_ref, bias_ref, o_ref,
                       m_sc, l_sc, acc_sc, *, heads):
    ki = pl.program_id(2)

    @pl.when(ki == 0)
    def _():
        m_sc[...] = jnp.full_like(m_sc, -jnp.inf)
        l_sc[...] = jnp.zeros_like(l_sc)
        acc_sc[...] = jnp.zeros_like(acc_sc)

    h = q_ref.shape[2]
    dh = h // heads
    bias = bias_ref[0]                                  # (1, tkv) additive mask

    # 1/sqrt(dh) is folded into W_q at parameter-construction time.
    for hi in range(heads):                             # static per-head unroll
        sl = slice(hi * dh, (hi + 1) * dh)
        qh = q_ref[0, :, sl]                            # (tq, dh)  bf16
        kh = k_ref[0, :, sl]                            # (tkv, dh) bf16
        vh = v_ref[0, :, sl]
        s = lax.dot_general(qh, kh, (((1,), (1,)), ((), ())),
                            preferred_element_type=jnp.float32)
        s = s + bias
        m_prev = m_sc[hi]
        m_new = jnp.maximum(m_prev, jnp.max(s, axis=-1, keepdims=True))
        alpha = jnp.exp(m_prev - m_new)
        p = jnp.exp(s - m_new)
        l_sc[hi] = alpha * l_sc[hi] + jnp.sum(p, axis=-1, keepdims=True)
        acc_sc[hi] = alpha * acc_sc[hi] + jnp.dot(
            p.astype(jnp.bfloat16), vh, preferred_element_type=jnp.float32)
        m_sc[hi] = m_new

    @pl.when(ki == pl.num_programs(2) - 1)
    def _():
        outs = [acc_sc[hi] * pl.reciprocal(l_sc[hi], approx=True)
                for hi in range(heads)]
        o_ref[0] = jnp.concatenate(outs, axis=-1).astype(o_ref.dtype)


def pallas_flash_attention(qkv, attn_bias, *, heads, seq_tile=256):
    """qkv: (B, S, 3H) fused projection; attn_bias: (B, 1, S) additive mask."""
    b, s, three_h = qkv.shape
    h = three_h // 3
    dh = h // heads
    tile, s_pad = _tile_for(s, seq_tile, 128)
    qkv_p = _pad_axis(qkv, 1, s_pad)
    bias_p = _pad_axis(attn_bias, 2, s_pad, value=_NEG_INF)

    if h % 128 == 0:
        # Slice Q/K/V straight out of the fused activation via column-block
        # index maps -- no XLA head-split relayout.
        q_arr = k_arr = v_arr = qkv_p
        q_col, k_col, v_col = 0, 1, 2
    else:
        # TODO(synk): hidden not 128-aligned -> H-wide column blocks are not
        #             layout-legal; fall back to one XLA split (extra relayout).
        q_arr, k_arr, v_arr = jnp.split(qkv_p, 3, axis=-1)
        q_col = k_col = v_col = 0

    def _q_map(c):
        return lambda bi, qi, ki: (bi, qi, c)

    def _kv_map(c):
        return lambda bi, qi, ki: (bi, ki, c)

    out = pl.pallas_call(
        functools.partial(_flash_attn_kernel, heads=heads),
        grid=(b, s_pad // tile, s_pad // tile),
        in_specs=[
            pl.BlockSpec((1, tile, h), _q_map(q_col)),
            pl.BlockSpec((1, tile, h), _kv_map(k_col)),
            pl.BlockSpec((1, tile, h), _kv_map(v_col)),
            pl.BlockSpec((1, 1, tile), lambda bi, qi, ki: (bi, 0, ki)),
        ],
        out_specs=pl.BlockSpec((1, tile, h), lambda bi, qi, ki: (bi, qi, 0)),
        out_shape=jax.ShapeDtypeStruct((b, s_pad, h), jnp.bfloat16),
        scratch_shapes=[pltpu.VMEM((heads, tile, 1), jnp.float32),
                        pltpu.VMEM((heads, tile, 1), jnp.float32),
                        pltpu.VMEM((heads, tile, dh), jnp.float32)],
        compiler_params=pltpu.CompilerParams(
            dimension_semantics=("parallel", "parallel", "arbitrary"),
            vmem_limit_bytes=_VMEM_LIMIT),
    )(q_arr, k_arr, v_arr, bias_p)
    return out[:, :s, :] if s_pad != s else out


# ----------------------------------------------------------------------------
# Kernel 4: MLM head = Linear(hidden, vocab) + LogSoftmax, single fused pass.
#   The (tm, V) logits slab lives in the resident output VMEM block across the
#   vocab grid axis; the log-sum-exp is finalized under pl.when(last tile).
# ----------------------------------------------------------------------------
def _mlm_logsoftmax_kernel(x_ref, w_ref, bias_ref, o_ref, m_ref, l_ref):
    j = pl.program_id(1)

    @pl.when(j == 0)
    def _():
        m_ref[...] = jnp.full_like(m_ref, -jnp.inf)
        l_ref[...] = jnp.zeros_like(l_ref)

    logits = jnp.dot(x_ref[...], w_ref[...],
                     preferred_element_type=jnp.float32) + bias_ref[...]
    tv = w_ref.shape[1]
    col = pl.multiple_of(j * tv, tv)
    o_ref[:, pl.ds(col, tv)] = logits      # park raw logits in the resident block

    m_prev = m_ref[...]
    m_new = jnp.maximum(m_prev, jnp.max(logits, axis=-1, keepdims=True))
    l_ref[...] = l_ref[...] * jnp.exp(m_prev - m_new) + jnp.sum(
        jnp.exp(logits - m_new), axis=-1, keepdims=True)
    m_ref[...] = m_new

    @pl.when(j == pl.num_programs(1) - 1)
    def _():
        lse = m_ref[...] + jnp.log(l_ref[...])
        o_ref[...] = o_ref[...] - lse


def pallas_mlm_log_softmax(x, w, bias, *, tm=128, tv=512):
    # TODO(synk): on v7x-sized VMEM with very large vocab, shrink tm (or keep
    #             the resident slab bf16 / recompute logits) to stay in budget.
    m_rows, hdim = x.shape
    v = w.shape[1]
    tm, m_pad = _tile_for(m_rows, tm, 8)
    tv, v_pad = _tile_for(v, tv, 128)
    x_p = _pad_axis(x, 0, m_pad)
    w_p = _pad_axis(w, 1, v_pad)
    # Pad bias with a large negative so padded vocab columns never win the LSE.
    bias_p = _pad_axis(bias.reshape(1, v), 1, v_pad, value=_NEG_INF)
    out = pl.pallas_call(
        _mlm_logsoftmax_kernel,
        grid=(m_pad // tm, v_pad // tv),
        in_specs=[
            pl.BlockSpec((tm, hdim), lambda i, j: (i, 0)),
            pl.BlockSpec((hdim, tv), lambda i, j: (0, j)),
            pl.BlockSpec((1, tv), lambda i, j: (0, j)),
        ],
        out_specs=pl.BlockSpec((tm, v_pad), lambda i, j: (i, 0)),  # resident across vocab
        out_shape=jax.ShapeDtypeStruct((m_pad, v_pad), jnp.float32),
        scratch_shapes=[pltpu.VMEM((tm, 1), jnp.float32),
                        pltpu.VMEM((tm, 1), jnp.float32)],
        compiler_params=pltpu.CompilerParams(
            dimension_semantics=("parallel", "arbitrary"),
            vmem_limit_bytes=_VMEM_LIMIT),
    )(x_p, w_p, bias_p)
    return out[:m_rows, :v] if (m_pad != m_rows or v_pad != v) else out


# ----------------------------------------------------------------------------
# Model wiring (embedding gathers remain thin XLA glue)
# ----------------------------------------------------------------------------
def transformer_block(x2d, attn_bias, p, *, batch, seq, heads):
    h = x2d.shape[-1]
    # Self-attention sublayer (pre-LN fused into the QKV matmul).
    qkv = pallas_ln_matmul(x2d, p["ln1_g"], p["ln1_b"], p["w_qkv"], p["b_qkv"])
    ctx = pallas_flash_attention(qkv.reshape(batch, seq, 3 * h), attn_bias,
                                 heads=heads)
    x2d = pallas_matmul_residual(ctx.reshape(batch * seq, h),
                                 p["w_o"], p["b_o"], x2d)
    # Feed-forward sublayer (LN + GELU fused; residual fused).
    ffh = pallas_ln_matmul(x2d, p["ln2_g"], p["ln2_b"], p["w_1"], p["b_1"],
                           activation="gelu")
    x2d = pallas_matmul_residual(ffh, p["w_2"], p["b_2"], x2d)
    return x2d


def bert_lm_lss_forward(token_seq, pos_mask, params, *, heads):
    """BERTLMLSS.forward: log_softmax(Linear(BERTLSS(token_seq, pos_mask)))."""
    b, s = token_seq.shape
    hid = params["tok_emb"].shape[1]

    # Embedding: token + positional (pos_mask used as position ids).
    x = (params["tok_emb"][token_seq]
         + params["pos_emb"][pos_mask]).astype(jnp.bfloat16)
    x2d = x.reshape(b * s, hid)

    # Additive key-padding mask (0 for real tokens, -1e9 for padding).
    attn_bias = jnp.where(token_seq > 0, 0.0, _NEG_INF).astype(
        jnp.float32).reshape(b, 1, s)

    for lp in params["layers"]:
        x2d = transformer_block(x2d, attn_bias, lp, batch=b, seq=s, heads=heads)

    # TODO(synk): pre-LN reconstruction has no final LayerNorm before the head,
    #             matching the BERT-pytorch SublayerConnection wiring.
    out2d = pallas_mlm_log_softmax(x2d, params["mlm_w"], params["mlm_b"])
    return out2d.reshape(b, s, -1)


# ----------------------------------------------------------------------------
# Deterministic parameter construction (weights pre-transposed to (in, out),
# stored bf16; QKV fused into one (H, 3H) weight with the softmax scale folded
# into the Q columns).
# ----------------------------------------------------------------------------
def make_params(key, *, vocab, hidden, max_pos, n_layers, heads, ff):
    keys = iter(jax.random.split(key, 4 + 4 * n_layers))

    def dense(kw, in_f, out_f):
        scale = 1.0 / (in_f ** 0.5)
        return jax.random.uniform(kw, (in_f, out_f), jnp.float32, -scale, scale)

    params = {
        "tok_emb": (0.02 * jax.random.normal(next(keys), (vocab, hidden))
                    ).astype(jnp.bfloat16),
        "pos_emb": (0.02 * jax.random.normal(next(keys), (max_pos, hidden))
                    ).astype(jnp.bfloat16),
        "mlm_w": dense(next(keys), hidden, vocab).astype(jnp.bfloat16),
        "mlm_b": jnp.zeros((vocab,), jnp.float32),
        "layers": [],
    }
    attn_scale = 1.0 / ((hidden // heads) ** 0.5)
    for _ in range(n_layers):
        w_qkv = dense(next(keys), hidden, 3 * hidden)
        # Fold 1/sqrt(dh) into the Q projection (offline, zero runtime cost).
        w_qkv = w_qkv.at[:, :hidden].multiply(attn_scale)
        lp = {
            "w_qkv": w_qkv.astype(jnp.bfloat16),
            "b_qkv": jnp.zeros((3 * hidden,), jnp.float32),
            "w_o": dense(next(keys), hidden, hidden).astype(jnp.bfloat16),
            "b_o": jnp.zeros((hidden,), jnp.float32),
            "w_1": dense(next(keys), hidden, ff).astype(jnp.bfloat16),
            "b_1": jnp.zeros((ff,), jnp.float32),
            "w_2": dense(next(keys), ff, hidden).astype(jnp.bfloat16),
            "b_2": jnp.zeros((hidden,), jnp.float32),
            "ln1_g": jnp.ones((hidden,), jnp.float32),
            "ln1_b": jnp.zeros((hidden,), jnp.float32),
            "ln2_g": jnp.ones((hidden,), jnp.float32),
            "ln2_b": jnp.zeros((hidden,), jnp.float32),
        }
        params["layers"].append(lp)
    return params


# ----------------------------------------------------------------------------
if __name__ == "__main__":
    # Small shapes; vocab deliberately non-128-aligned to exercise padding.
    VOCAB, HIDDEN, MAX_POS = 300, 128, 64
    N_LAYERS, HEADS, FF = 2, 2, 256
    BATCH, SEQ = 2, 8

    root = jax.random.PRNGKey(0)
    k_params, k_tok = jax.random.split(root)

    params = make_params(k_params, vocab=VOCAB, hidden=HIDDEN, max_pos=MAX_POS,
                         n_layers=N_LAYERS, heads=HEADS, ff=FF)

    token_seq = jax.random.randint(k_tok, (BATCH, SEQ), 1, VOCAB,
                                   dtype=jnp.int32)
    pos_mask = jnp.broadcast_to(jnp.arange(SEQ, dtype=jnp.int32)[None, :],
                                (BATCH, SEQ))

    fwd = jax.jit(functools.partial(bert_lm_lss_forward, heads=HEADS))
    out = fwd(token_seq, pos_mask, params)
    jax.block_until_ready(out)

    assert out.shape == (BATCH, SEQ, VOCAB)
    assert bool(jnp.all(jnp.isfinite(out)))
    # log-softmax rows must exponentiate-and-sum to ~1
    row_sums = jnp.exp(out).sum(-1)
    assert bool(jnp.all(jnp.abs(row_sums - 1.0) < 1e-3))
    print("KERNEL_OK")
</pallas_src>

<mosaic_0001>
module attributes {stable_mosaic.version = 11 : i64} {
  func.func @_ln_matmul_kernel(%arg0: i32, %arg1: i32, %arg2: memref<16x128xbf16, #tpu.memory_space<vmem>>, %arg3: memref<1x128xf32, #tpu.memory_space<vmem>>, %arg4: memref<1x128xf32, #tpu.memory_space<vmem>>, %arg5: memref<128x256xbf16, #tpu.memory_space<vmem>>, %arg6: memref<1x256xf32, #tpu.memory_space<vmem>>, %arg7: memref<16x256xbf16, #tpu.memory_space<vmem>>) attributes {dimension_semantics = [#tpu.dimension_semantics<parallel>, #tpu.dimension_semantics<parallel>], iteration_bounds = array<i64: 1, 2>, scalar_prefetch = 0 : i64, scratch_operands = 0 : i64, tpu.core_type = #tpu.core_type<tc>, window_params = [{transform_indices = @transform_0, window_bounds = array<i64: 16, 128>}, {pipeline_mode = #tpu.pipeline_mode<synchronous>, transform_indices = @transform_1, window_bounds = array<i64: 1, 128>}, {pipeline_mode = #tpu.pipeline_mode<synchronous>, transform_indices = @transform_2, window_bounds = array<i64: 1, 128>}, {transform_indices = @transform_3, window_bounds = array<i64: 128, 256>}, {transform_indices = @transform_4, window_bounds = array<i64: 1, 256>}, {transform_indices = @transform_5, window_bounds = array<i64: 16, 256>}]} {
    %c0 = arith.constant 0 : index
    %c0_0 = arith.constant 0 : index
    %0 = vector.load %arg2[%c0, %c0_0] : memref<16x128xbf16, #tpu.memory_space<vmem>>, vector<16x128xbf16>
    %1 = arith.extf %0 : vector<16x128xbf16> to vector<16x128xf32>
    %cst = arith.constant dense<0.000000e+00> : vector<16xf32>
    %2 = vector.multi_reduction <add>, %1, %cst [1] : vector<16x128xf32> to vector<16xf32>
    %3 = vector.shape_cast %2 : vector<16xf32> to vector<16x1xf32>
    %cst_1 = arith.constant 1.280000e+02 : f32
    %4 = vector.broadcast %cst_1 : f32 to vector<16x1xf32>
    %5 = arith.divf %3, %4 : vector<16x1xf32>
    %6 = vector.broadcast %5 : vector<16x1xf32> to vector<16x128xf32>
    %7 = arith.subf %1, %6 : vector<16x128xf32>
    %8 = arith.mulf %7, %7 : vector<16x128xf32>
    %cst_2 = arith.constant dense<0.000000e+00> : vector<16xf32>
    %9 = vector.multi_reduction <add>, %8, %cst_2 [1] : vector<16x128xf32> to vector<16xf32>
    %10 = vector.shape_cast %9 : vector<16xf32> to vector<16x1xf32>
    %cst_3 = arith.constant 1.280000e+02 : f32
    %11 = vector.broadcast %cst_3 : f32 to vector<16x1xf32>
    %12 = arith.divf %10, %11 : vector<16x1xf32>
    %c0_4 = arith.constant 0 : index
    %c0_5 = arith.constant 0 : index
    %13 = vector.load %arg3[%c0_4, %c0_5] : memref<1x128xf32, #tpu.memory_space<vmem>>, vector<1x128xf32>
    %14 = vector.broadcast %13 : vector<1x128xf32> to vector<16x128xf32>
    %15 = arith.mulf %14, %7 : vector<16x128xf32>
    %cst_6 = arith.constant 9.99999997E-7 : f32
    %16 = vector.broadcast %cst_6 : f32 to vector<16x1xf32>
    %17 = arith.addf %12, %16 : vector<16x1xf32>
    %18 = math.rsqrt %17 : vector<16x1xf32>
    %19 = vector.broadcast %18 : vector<16x1xf32> to vector<16x128xf32>
    %20 = arith.mulf %15, %19 : vector<16x128xf32>
    %c0_7 = arith.constant 0 : index
    %c0_8 = arith.constant 0 : index
    %21 = vector.load %arg4[%c0_7, %c0_8] : memref<1x128xf32, #tpu.memory_space<vmem>>, vector<1x128xf32>
    %22 = vector.broadcast %21 : vector<1x128xf32> to vector<16x128xf32>
    %23 = arith.addf %20, %22 : vector<16x128xf32>
    %24 = arith.truncf %23 : vector<16x128xf32> to vector<16x128xbf16>
    %c0_9 = arith.constant 0 : index
    %c0_10 = arith.constant 0 : index
    %25 = vector.load %arg5[%c0_9, %c0_10] : memref<128x256xbf16, #tpu.memory_space<vmem>>, vector<128x256xbf16>
    %cst_11 = arith.constant dense<0.000000e+00> : vector<16x256xf32>
    %26 = tpu.matmul %24, %25, %cst_11 {dimension_numbers = #tpu.dot_dimension_numbers<[1], [0], [0], [1], [0, 0, 1, 1], [], []>} : vector<16x128xbf16>, vector<128x256xbf16>, vector<16x256xf32> -> vector<16x256xf32>
    %c0_12 = arith.constant 0 : index
    %c0_13 = arith.constant 0 : index
    %27 = vector.load %arg6[%c0_12, %c0_13] : memref<1x256xf32, #tpu.memory_space<vmem>>, vector<1x256xf32>
    %28 = vector.broadcast %27 : vector<1x256xf32> to vector<16x256xf32>
    %29 = arith.addf %26, %28 : vector<16x256xf32>
    %30 = arith.truncf %29 : vector<16x256xf32> to vector<16x256xbf16>
    %c0_14 = arith.constant 0 : index
    %c0_15 = arith.constant 0 : index
    %31 = vector.load %arg7[%c0_14, %c0_15] : memref<16x256xbf16, #tpu.memory_space<vmem>>, vector<16x256xbf16>
    tpu.vector_store %arg7[%c0_14, %c0_15], %30 {strides = array<i32>} : memref<16x256xbf16, #tpu.memory_space<vmem>>, vector<16x256xbf16>,
    return
  }
  func.func @transform_0(%arg0: i32, %arg1: i32) -> (i32, i32) {
    %c0_i32 = arith.constant 0 : i32
    %c0_i32_0 = arith.constant 0 : i32
    return %arg0, %c0_i32 : i32, i32
  }
  func.func @transform_1(%arg0: i32, %arg1: i32) -> (i32, i32) {
    %c0_i32 = arith.constant 0 : i32
    %c0_i32_0 = arith.constant 0 : i32
    %c0_i32_1 = arith.constant 0 : i32
    return %c0_i32, %c0_i32_0 : i32, i32
  }
  func.func @transform_2(%arg0: i32, %arg1: i32) -> (i32, i32) {
    %c0_i32 = arith.constant 0 : i32
    %c0_i32_0 = arith.constant 0 : i32
    %c0_i32_1 = arith.constant 0 : i32
    return %c0_i32, %c0_i32_0 : i32, i32
  }
  func.func @transform_3(%arg0: i32, %arg1: i32) -> (i32, i32) {
    %c0_i32 = arith.constant 0 : i32
    %c0_i32_0 = arith.constant 0 : i32
    return %c0_i32, %arg1 : i32, i32
  }
  func.func @transform_4(%arg0: i32, %arg1: i32) -> (i32, i32) {
    %c0_i32 = arith.constant 0 : i32
    %c0_i32_0 = arith.constant 0 : i32
    return %c0_i32, %arg1 : i32, i32
  }
  func.func @transform_5(%arg0: i32, %arg1: i32) -> (i32, i32) {
    %c0_i32 = arith.constant 0 : i32
    return %arg0, %arg1 : i32, i32
  }
}

module attributes {stable_mosaic.version = 11 : i64} {
  func.func @_matmul_res_kernel(%arg0: i32, %arg1: i32, %arg2: i32, %arg3: memref<16x128xbf16, #tpu.memory_space<vmem>>, %arg4: memref<128x128xbf16, #tpu.memory_space<vmem>>, %arg5: memref<1x128xf32, #tpu.memory_space<vmem>>, %arg6: memref<16x128xbf16, #tpu.memory_space<vmem>>, %arg7: memref<16x128xbf16, #tpu.memory_space<vmem>>, %arg8: memref<16x128xf32, #tpu.memory_space<vmem>>) attributes {dimension_semantics = [#tpu.dimension_semantics<parallel>, #tpu.dimension_semantics<parallel>, #tpu.dimension_semantics<arbitrary>], iteration_bounds = array<i64: 1, 1, 1>, scalar_prefetch = 0 : i64, scratch_operands = 1 : i64, tpu.core_type = #tpu.core_type<tc>, window_params = [{transform_indices = @transform_0, window_bounds = array<i64: 16, 128>}, {transform_indices = @transform_1, window_bounds = array<i64: 128, 128>}, {transform_indices = @transform_2, window_bounds = array<i64: 1, 128>}, {transform_indices = @transform_3, window_bounds = array<i64: 16, 128>}, {transform_indices = @transform_4, window_bounds = array<i64: 16, 128>}]} {
    %c0_i32 = arith.constant 0 : i32
    %0 = arith.cmpi eq, %arg2, %c0_i32 : i32
    %1 = arith.extui %0 : i1 to i32
    %c0_i32_0 = arith.constant 0 : i32
    %2 = arith.cmpi ne, %1, %c0_i32_0 : i32
    scf.if %2 {
      %cst_10 = arith.constant 0.000000e+00 : f32
      %12 = vector.broadcast %cst_10 : f32 to vector<16x128xf32>
      %c0_11 = arith.constant 0 : index
      %c0_12 = arith.constant 0 : index
      %13 = vector.load %arg8[%c0_11, %c0_12] : memref<16x128xf32, #tpu.memory_space<vmem>>, vector<16x128xf32>
      tpu.vector_store %arg8[%c0_11, %c0_12], %12 {strides = array<i32>} : memref<16x128xf32, #tpu.memory_space<vmem>>, vector<16x128xf32>,
    } else {
    }
    %c0 = arith.constant 0 : index
    %c0_1 = arith.constant 0 : index
    %3 = vector.load %arg8[%c0, %c0_1] : memref<16x128xf32, #tpu.memory_space<vmem>>, vector<16x128xf32>
    %c0_2 = arith.constant 0 : index
    %c0_3 = arith.constant 0 : index
    %4 = vector.load %arg3[%c0_2, %c0_3] : memref<16x128xbf16, #tpu.memory_space<vmem>>, vector<16x128xbf16>
    %c0_4 = arith.constant 0 : index
    %c0_5 = arith.constant 0 : index
    %5 = vector.load %arg4[%c0_4, %c0_5] : memref<128x128xbf16, #tpu.memory_space<vmem>>, vector<128x128xbf16>
    %cst = arith.constant dense<0.000000e+00> : vector<16x128xf32>
    %6 = tpu.matmul %4, %5, %cst {dimension_numbers = #tpu.dot_dimension_numbers<[1], [0], [0], [1], [0, 0, 1, 1], [], []>} : vector<16x128xbf16>, vector<128x128xbf16>, vector<16x128xf32> -> vector<16x128xf32>
    %7 = arith.addf %3, %6 : vector<16x128xf32>
    %c0_6 = arith.constant 0 : index
    %c0_7 = arith.constant 0 : index
    %8 = vector.load %arg8[%c0_6, %c0_7] : memref<16x128xf32, #tpu.memory_space<vmem>>, vector<16x128xf32>
    tpu.vector_store %arg8[%c0_6, %c0_7], %7 {strides = array<i32>} : memref<16x128xf32, #tpu.memory_space<vmem>>, vector<16x128xf32>,
    %c0_i32_8 = arith.constant 0 : i32
    %9 = arith.cmpi eq, %arg2, %c0_i32_8 : i32
    %10 = arith.extui %9 : i1 to i32
    %c0_i32_9 = arith.constant 0 : i32
    %11 = arith.cmpi ne, %10, %c0_i32_9 : i32
    scf.if %11 {
      %c0_10 = arith.constant 0 : index
      %c0_11 = arith.constant 0 : index
      %12 = vector.load %arg8[%c0_10, %c0_11] : memref<16x128xf32, #tpu.memory_space<vmem>>, vector<16x128xf32>
      %c0_12 = arith.constant 0 : index
      %c0_13 = arith.constant 0 : index
      %13 = vector.load %arg5[%c0_12, %c0_13] : memref<1x128xf32, #tpu.memory_space<vmem>>, vector<1x128xf32>
      %14 = vector.broadcast %13 : vector<1x128xf32> to vector<16x128xf32>
      %15 = arith.addf %12, %14 : vector<16x128xf32>
      %c0_14 = arith.constant 0 : index
      %c0_15 = arith.constant 0 : index
      %16 = vector.load %arg6[%c0_14, %c0_15] : memref<16x128xbf16, #tpu.memory_space<vmem>>, vector<16x128xbf16>
      %17 = arith.extf %16 : vector<16x128xbf16> to vector<16x128xf32>
      %18 = arith.addf %15, %17 : vector<16x128xf32>
      %19 = arith.truncf %18 : vector<16x128xf32> to vector<16x128xbf16>
      %c0_16 = arith.constant 0 : index
      %c0_17 = arith.constant 0 : index
      %20 = vector.load %arg7[%c0_16, %c0_17] : memref<16x128xbf16, #tpu.memory_space<vmem>>, vector<16x128xbf16>
      tpu.vector_store %arg7[%c0_16, %c0_17], %19 {strides = array<i32>} : memref<16x128xbf16, #tpu.memory_space<vmem>>, vector<16x128xbf16>,
    } else {
    }
    return
  }
  func.func @transform_0(%arg0: i32, %arg1: i32, %arg2: i32) -> (i32, i32) {
    %c0_i32 = arith.constant 0 : i32
    return %arg0, %arg2 : i32, i32
  }
  func.func @transform_1(%arg0: i32, %arg1: i32, %arg2: i32) -> (i32, i32) {
    %c0_i32 = arith.constant 0 : i32
    return %arg2, %arg1 : i32, i32
  }
  func.func @transform_2(%arg0: i32, %arg1: i32, %arg2: i32) -> (i32, i32) {
    %c0_i32 = arith.constant 0 : i32
    %c0_i32_0 = arith.constant 0 : i32
    return %c0_i32, %arg1 : i32, i32
  }
  func.func @transform_3(%arg0: i32, %arg1: i32, %arg2: i32) -> (i32, i32) {
    %c0_i32 = arith.constant 0 : i32
    return %arg0, %arg1 : i32, i32
  }
  func.func @transform_4(%arg0: i32, %arg1: i32, %arg2: i32) -> (i32, i32) {
    %c0_i32 = arith.constant 0 : i32
    return %arg0, %arg1 : i32, i32
  }
}

module attributes {stable_mosaic.version = 11 : i64} {
  func.func @_flash_attn_kernel(%arg0: i32, %arg1: i32, %arg2: i32, %arg3: memref<1x8x128xbf16, #tpu.memory_space<vmem>>, %arg4: memref<1x8x128xbf16, #tpu.memory_space<vmem>>, %arg5: memref<1x8x128xbf16, #tpu.memory_space<vmem>>, %arg6: memref<1x1x8xf32, #tpu.memory_space<vmem>>, %arg7: memref<1x8x128xbf16, #tpu.memory_space<vmem>>, %arg8: memref<2x8x1xf32, #tpu.memory_space<vmem>>, %arg9: memref<2x8x1xf32, #tpu.memory_space<vmem>>, %arg10: memref<2x8x64xf32, #tpu.memory_space<vmem>>) attributes {dimension_semantics = [#tpu.dimension_semantics<parallel>, #tpu.dimension_semantics<parallel>, #tpu.dimension_semantics<arbitrary>], iteration_bounds = array<i64: 2, 1, 1>, scalar_prefetch = 0 : i64, scratch_operands = 3 : i64, tpu.core_type = #tpu.core_type<tc>, window_params = [{transform_indices = @transform_0, window_bounds = array<i64: 1, 8, 128>}, {transform_indices = @transform_1, window_bounds = array<i64: 1, 8, 128>}, {transform_indices = @transform_2, window_bounds = array<i64: 1, 8, 128>}, {transform_indices = @transform_3, window_bounds = array<i64: 1, 1, 8>}, {transform_indices = @transform_4, window_bounds = array<i64: 1, 8, 128>}]} {
    %c0_i32 = arith.constant 0 : i32
    %0 = arith.cmpi eq, %arg2, %c0_i32 : i32
    %1 = arith.extui %0 : i1 to i32
    %c0_i32_0 = arith.constant 0 : i32
    %2 = arith.cmpi ne, %1, %c0_i32_0 : i32
    scf.if %2 {
      %cst_64 = arith.constant 0xFF800000 : f32
      %90 = vector.broadcast %cst_64 : f32 to vector<2x8x1xf32>
      %c0_65 = arith.constant 0 : index
      %c0_66 = arith.constant 0 : index
      %c0_67 = arith.constant 0 : index
      %91 = vector.load %arg8[%c0_65, %c0_66, %c0_67] : memref<2x8x1xf32, #tpu.memory_space<vmem>>, vector<2x8x1xf32>
      tpu.vector_store %arg8[%c0_65, %c0_66, %c0_67], %90 {strides = array<i32>} : memref<2x8x1xf32, #tpu.memory_space<vmem>>, vector<2x8x1xf32>,
      %cst_68 = arith.constant 0.000000e+00 : f32
      %92 = vector.broadcast %cst_68 : f32 to vector<2x8x1xf32>
      %c0_69 = arith.constant 0 : index
      %c0_70 = arith.constant 0 : index
      %c0_71 = arith.constant 0 : index
      %93 = vector.load %arg9[%c0_69, %c0_70, %c0_71] : memref<2x8x1xf32, #tpu.memory_space<vmem>>, vector<2x8x1xf32>
      tpu.vector_store %arg9[%c0_69, %c0_70, %c0_71], %92 {strides = array<i32>} : memref<2x8x1xf32, #tpu.memory_space<vmem>>, vector<2x8x1xf32>,
      %cst_72 = arith.constant 0.000000e+00 : f32
      %94 = vector.broadcast %cst_72 : f32 to vector<2x8x64xf32>
      %c0_73 = arith.constant 0 : index
      %c0_74 = arith.constant 0 : index
      %c0_75 = arith.constant 0 : index
      %95 = vector.load %arg10[%c0_73, %c0_74, %c0_75] : memref<2x8x64xf32, #tpu.memory_space<vmem>>, vector<2x8x64xf32>
      tpu.vector_store %arg10[%c0_73, %c0_74, %c0_75], %94 {strides = array<i32>} : memref<2x8x64xf32, #tpu.memory_space<vmem>>, vector<2x8x64xf32>,
    } else {
    }
    %c0 = arith.constant 0 : index
    %c0_1 = arith.constant 0 : index
    %c0_2 = arith.constant 0 : index
    %3 = vector.load %arg6[%c0, %c0_1, %c0_2] : memref<1x1x8xf32, #tpu.memory_space<vmem>>, vector<1x1x8xf32>
    %4 = vector.shape_cast %3 : vector<1x1x8xf32> to vector<1x8xf32>
    %c0_3 = arith.constant 0 : index
    %c0_4 = arith.constant 0 : index
    %c0_5 = arith.constant 0 : index
    %5 = vector.load %arg3[%c0_3, %c0_4, %c0_5] : memref<1x8x128xbf16, #tpu.memory_space<vmem>>, vector<1x8x64xbf16>
    %6 = vector.shape_cast %5 : vector<1x8x64xbf16> to vector<8x64xbf16>
    %c0_6 = arith.constant 0 : index
    %c0_7 = arith.constant 0 : index
    %c0_8 = arith.constant 0 : index
    %7 = vector.load %arg4[%c0_6, %c0_7, %c0_8] : memref<1x8x128xbf16, #tpu.memory_space<vmem>>, vector<1x8x64xbf16>
    %8 = vector.shape_cast %7 : vector<1x8x64xbf16> to vector<8x64xbf16>
    %c0_9 = arith.constant 0 : index
    %c0_10 = arith.constant 0 : index
    %c0_11 = arith.constant 0 : index
    %9 = vector.load %arg5[%c0_9, %c0_10, %c0_11] : memref<1x8x128xbf16, #tpu.memory_space<vmem>>, vector<1x8x64xbf16>
    %10 = vector.shape_cast %9 : vector<1x8x64xbf16> to vector<8x64xbf16>
    %cst = arith.constant dense<0.000000e+00> : vector<8x8xf32>
    %11 = tpu.matmul %6, %8, %cst {dimension_numbers = #tpu.dot_dimension_numbers<[1], [1], [0], [0], [0, 0, 1, 0], [], []>} : vector<8x64xbf16>, vector<8x64xbf16>, vector<8x8xf32> -> vector<8x8xf32>
    %12 = vector.broadcast %4 : vector<1x8xf32> to vector<8x8xf32>
    %13 = arith.addf %11, %12 : vector<8x8xf32>
    %c0_12 = arith.constant 0 : index
    %c0_13 = arith.constant 0 : index
    %c0_14 = arith.constant 0 : index
    %14 = vector.load %arg8[%c0_12, %c0_13, %c0_14] : memref<2x8x1xf32, #tpu.memory_space<vmem>>, vector<1x8x1xf32>
    %15 = vector.shape_cast %14 : vector<1x8x1xf32> to vector<8x1xf32>
    %cst_15 = arith.constant dense<0xFF800000> : vector<8xf32>
    %16 = vector.multi_reduction <maximumf>, %13, %cst_15 [1] : vector<8x8xf32> to vector<8xf32>
    %17 = vector.shape_cast %16 : vector<8xf32> to vector<8x1xf32>
    %18 = arith.maximumf %15, %17 : vector<8x1xf32>
    %19 = arith.subf %15, %18 : vector<8x1xf32>
    %20 = math.exp %19 : vector<8x1xf32>
    %21 = vector.broadcast %18 : vector<8x1xf32> to vector<8x8xf32>
    %22 = arith.subf %13, %21 : vector<8x8xf32>
    %23 = math.exp %22 : vector<8x8xf32>
    %c0_16 = arith.constant 0 : index
    %c0_17 = arith.constant 0 : index
    %c0_18 = arith.constant 0 : index
    %24 = vector.load %arg9[%c0_16, %c0_17, %c0_18] : memref<2x8x1xf32, #tpu.memory_space<vmem>>, vector<1x8x1xf32>
    %25 = vector.shape_cast %24 : vector<1x8x1xf32> to vector<8x1xf32>
    %26 = arith.mulf %20, %25 : vector<8x1xf32>
    %cst_19 = arith.constant dense<0.000000e+00> : vector<8xf32>
    %27 = vector.multi_reduction <add>, %23, %cst_19 [1] : vector<8x8xf32> to vector<8xf32>
    %28 = vector.shape_cast %27 : vector<8xf32> to vector<8x1xf32>
    %29 = arith.addf %26, %28 : vector<8x1xf32>
    %c0_20 = arith.constant 0 : index
    %c0_21 = arith.constant 0 : index
    %c0_22 = arith.constant 0 : index
    %30 = vector.load %arg9[%c0_20, %c0_21, %c0_22] : memref<2x8x1xf32, #tpu.memory_space<vmem>>, vector<1x8x1xf32>
    %31 = vector.shape_cast %30 : vector<1x8x1xf32> to vector<8x1xf32>
    %32 = vector.shape_cast %29 : vector<8x1xf32> to vector<1x8x1xf32>
    tpu.vector_store %arg9[%c0_20, %c0_21, %c0_22], %32 {strides = array<i32>} : memref<2x8x1xf32, #tpu.memory_space<vmem>>, vector<1x8x1xf32>,
    %c0_23 = arith.constant 0 : index
    %c0_24 = arith.constant 0 : index
    %c0_25 = arith.constant 0 : index
    %33 = vector.load %arg10[%c0_23, %c0_24, %c0_25] : memref<2x8x64xf32, #tpu.memory_space<vmem>>, vector<1x8x64xf32>
    %34 = vector.shape_cast %33 : vector<1x8x64xf32> to vector<8x64xf32>
    %35 = vector.broadcast %20 : vector<8x1xf32> to vector<8x64xf32>
    %36 = arith.mulf %35, %34 : vector<8x64xf32>
    %37 = arith.truncf %23 : vector<8x8xf32> to vector<8x8xbf16>
    %cst_26 = arith.constant dense<0.000000e+00> : vector<8x64xf32>
    %38 = tpu.matmul %37, %10, %cst_26 {dimension_numbers = #tpu.dot_dimension_numbers<[1], [0], [0], [1], [0, 0, 1, 1], [], []>} : vector<8x8xbf16>, vector<8x64xbf16>, vector<8x64xf32> -> vector<8x64xf32>
    %39 = arith.addf %36, %38 : vector<8x64xf32>
    %c0_27 = arith.constant 0 : index
    %c0_28 = arith.constant 0 : index
    %c0_29 = arith.constant 0 : index
    %40 = vector.load %arg10[%c0_27, %c0_28, %c0_29] : memref<2x8x64xf32, #tpu.memory_space<vmem>>, vector<1x8x64xf32>
    %41 = vector.shape_cast %40 : vector<1x8x64xf32> to vector<8x64xf32>
    %42 = vector.shape_cast %39 : vector<8x64xf32> to vector<1x8x64xf32>
    tpu.vector_store %arg10[%c0_27, %c0_28, %c0_29], %42 {strides = array<i32>} : memref<2x8x64xf32, #tpu.memory_space<vmem>>, vector<1x8x64xf32>,
    %c0_30 = arith.constant 0 : index
    %c0_31 = arith.constant 0 : index
    %c0_32 = arith.constant 0 : index
    %43 = vector.load %arg8[%c0_30, %c0_31, %c0_32] : memref<2x8x1xf32, #tpu.memory_space<vmem>>, vector<1x8x1xf32>
    %44 = vector.shape_cast %43 : vector<1x8x1xf32> to vector<8x1xf32>
    %45 = vector.shape_cast %18 : vector<8x1xf32> to vector<1x8x1xf32>
    tpu.vector_store %arg8[%c0_30, %c0_31, %c0_32], %45 {strides = array<i32>} : memref<2x8x1xf32, #tpu.memory_space<vmem>>, vector<1x8x1xf32>,
    %c0_33 = arith.constant 0 : index
    %c0_34 = arith.constant 0 : index
    %c64 = arith.constant 64 : index
    %46 = vector.load %arg3[%c0_33, %c0_34, %c64] : memref<1x8x128xbf16, #tpu.memory_space<vmem>>, vector<1x8x64xbf16>
    %47 = vector.shape_cast %46 : vector<1x8x64xbf16> to vector<8x64xbf16>
    %c0_35 = arith.constant 0 : index
    %c0_36 = arith.constant 0 : index
    %c64_37 = arith.constant 64 : index
    %48 = vector.load %arg4[%c0_35, %c0_36, %c64_37] : memref<1x8x128xbf16, #tpu.memory_space<vmem>>, vector<1x8x64xbf16>
    %49 = vector.shape_cast %48 : vector<1x8x64xbf16> to vector<8x64xbf16>
    %c0_38 = arith.constant 0 : index
    %c0_39 = arith.constant 0 : index
    %c64_40 = arith.constant 64 : index
    %50 = vector.load %arg5[%c0_38, %c0_39, %c64_40] : memref<1x8x128xbf16, #tpu.memory_space<vmem>>, vector<1x8x64xbf16>
    %51 = vector.shape_cast %50 : vector<1x8x64xbf16> to vector<8x64xbf16>
    %cst_41 = arith.constant dense<0.000000e+00> : vector<8x8xf32>
    %52 = tpu.matmul %47, %49, %cst_41 {dimension_numbers = #tpu.dot_dimension_numbers<[1], [1], [0], [0], [0, 0, 1, 0], [], []>} : vector<8x64xbf16>, vector<8x64xbf16>, vector<8x8xf32> -> vector<8x8xf32>
    %53 = vector.broadcast %4 : vector<1x8xf32> to vector<8x8xf32>
    %54 = arith.addf %52, %53 : vector<8x8xf32>
    %c1 = arith.constant 1 : index
    %c0_42 = arith.constant 0 : index
    %c0_43 = arith.constant 0 : index
    %55 = vector.load %arg8[%c1, %c0_42, %c0_43] : memref<2x8x1xf32, #tpu.memory_space<vmem>>, vector<1x8x1xf32>
    %56 = vector.shape_cast %55 : vector<1x8x1xf32> to vector<8x1xf32>
    %cst_44 = arith.constant dense<0xFF800000> : vector<8xf32>
    %57 = vector.multi_reduction <maximumf>, %54, %cst_44 [1] : vector<8x8xf32> to vector<8xf32>
    %58 = vector.shape_cast %57 : vector<8xf32> to vector<8x1xf32>
    %59 = arith.maximumf %56, %58 : vector<8x1xf32>
    %60 = arith.subf %56, %59 : vector<8x1xf32>
    %61 = math.exp %60 : vector<8x1xf32>
    %62 = vector.broadcast %59 : vector<8x1xf32> to vector<8x8xf32>
    %63 = arith.subf %54, %62 : vector<8x8xf32>
    %64 = math.exp %63 : vector<8x8xf32>
    %c1_45 = arith.constant 1 : index
    %c0_46 = arith.constant 0 : index
    %c0_47 = arith.constant 0 : index
    %65 = vector.load %arg9[%c1_45, %c0_46, %c0_47] : memref<2x8x1xf32, #tpu.memory_space<vmem>>, vector<1x8x1xf32>
    %66 = vector.shape_cast %65 : vector<1x8x1xf32> to vector<8x1xf32>
    %67 = arith.mulf %61, %66 : vector<8x1xf32>
    %cst_48 = arith.constant dense<0.000000e+00> : vector<8xf32>
    %68 = vector.multi_reduction <add>, %64, %cst_48 [1] : vector<8x8xf32> to vector<8xf32>
    %69 = vector.shape_cast %68 : vector<8xf32> to vector<8x1xf32>
    %70 = arith.addf %67, %69 : vector<8x1xf32>
    %c1_49 = arith.constant 1 : index
    %c0_50 = arith.constant 0 : index
    %c0_51 = arith.constant 0 : index
    %71 = vector.load %arg9[%c1_49, %c0_50, %c0_51] : memref<2x8x1xf32, #tpu.memory_space<vmem>>, vector<1x8x1xf32>
    %72 = vector.shape_cast %71 : vector<1x8x1xf32> to vector<8x1xf32>
    %73 = vector.shape_cast %70 : vector<8x1xf32> to vector<1x8x1xf32>
    tpu.vector_store %arg9[%c1_49, %c0_50, %c0_51], %73 {strides = array<i32>} : memref<2x8x1xf32, #tpu.memory_space<vmem>>, vector<1x8x1xf32>,
    %c1_52 = arith.constant 1 : index
    %c0_53 = arith.constant 0 : index
    %c0_54 = arith.constant 0 : index
    %74 = vector.load %arg10[%c1_52, %c0_53, %c0_54] : memref<2x8x64xf32, #tpu.memory_space<vmem>>, vector<1x8x64xf32>
    %75 = vector.shape_cast %74 : vector<1x8x64xf32> to vector<8x64xf32>
    %76 = vector.broadcast %61 : vector<8x1xf32> to vector<8x64xf32>
    %77 = arith.mulf %76, %75 : vector<8x64xf32>
    %78 = arith.truncf %64 : vector<8x8xf32> to vector<8x8xbf16>
    %cst_55 = arith.constant dense<0.000000e+00> : vector<8x64xf32>
    %79 = tpu.matmul %78, %51, %cst_55 {dimension_numbers = #tpu.dot_dimension_numbers<[1], [0], [0], [1], [0, 0, 1, 1], [], []>} : vector<8x8xbf16>, vector<8x64xbf16>, vector<8x64xf32> -> vector<8x64xf32>
    %80 = arith.addf %77, %79 : vector<8x64xf32>
    %c1_56 = arith.constant 1 : index
    %c0_57 = arith.constant 0 : index
    %c0_58 = arith.constant 0 : index
    %81 = vector.load %arg10[%c1_56, %c0_57, %c0_58] : memref<2x8x64xf32, #tpu.memory_space<vmem>>, vector<1x8x64xf32>
    %82 = vector.shape_cast %81 : vector<1x8x64xf32> to vector<8x64xf32>
    %83 = vector.shape_cast %80 : vector<8x64xf32> to vector<1x8x64xf32>
    tpu.vector_store %arg10[%c1_56, %c0_57, %c0_58], %83 {strides = array<i32>} : memref<2x8x64xf32, #tpu.memory_space<vmem>>, vector<1x8x64xf32>,
    %c1_59 = arith.constant 1 : index
    %c0_60 = arith.constant 0 : index
    %c0_61 = arith.constant 0 : index
    %84 = vector.load %arg8[%c1_59, %c0_60, %c0_61] : memref<2x8x1xf32, #tpu.memory_space<vmem>>, vector<1x8x1xf32>
    %85 = vector.shape_cast %84 : vector<1x8x1xf32> to vector<8x1xf32>
    %86 = vector.shape_cast %59 : vector<8x1xf32> to vector<1x8x1xf32>
    tpu.vector_store %arg8[%c1_59, %c0_60, %c0_61], %86 {strides = array<i32>} : memref<2x8x1xf32, #tpu.memory_space<vmem>>, vector<1x8x1xf32>,
    %c0_i32_62 = arith.constant 0 : i32
    %87 = arith.cmpi eq, %arg2, %c0_i32_62 : i32
    %88 = arith.extui %87 : i1 to i32
    %c0_i32_63 = arith.constant 0 : i32
    %89 = arith.cmpi ne, %88, %c0_i32_63 : i32
    scf.if %89 {
      %c0_64 = arith.constant 0 : index
      %c0_65 = arith.constant 0 : index
      %c0_66 = arith.constant 0 : index
      %90 = vector.load %arg10[%c0_64, %c0_65, %c0_66] : memref<2x8x64xf32, #tpu.memory_space<vmem>>, vector<1x8x64xf32>
      %91 = vector.shape_cast %90 : vector<1x8x64xf32> to vector<8x64xf32>
      %c0_67 = arith.constant 0 : index
      %c0_68 = arith.constant 0 : index
      %c0_69 = arith.constant 0 : index
      %92 = vector.load %arg9[%c0_67, %c0_68, %c0_69] : memref<2x8x1xf32, #tpu.memory_space<vmem>>, vector<1x8x1xf32>
      %93 = vector.shape_cast %92 : vector<1x8x1xf32> to vector<8x1xf32>
      %94 = tpu.reciprocal %93 {approx = true} : vector<8x1xf32> -> vector<8x1xf32>
      %95 = vector.broadcast %94 : vector<8x1xf32> to vector<8x64xf32>
      %96 = arith.mulf %91, %95 : vector<8x64xf32>
      %c1_70 = arith.constant 1 : index
      %c0_71 = arith.constant 0 : index
      %c0_72 = arith.constant 0 : index
      %97 = vector.load %arg10[%c1_70, %c0_71, %c0_72] : memref<2x8x64xf32, #tpu.memory_space<vmem>>, vector<1x8x64xf32>
      %98 = vector.shape_cast %97 : vector<1x8x64xf32> to vector<8x64xf32>
      %c1_73 = arith.constant 1 : index
      %c0_74 = arith.constant 0 : index
      %c0_75 = arith.constant 0 : index
      %99 = vector.load %arg9[%c1_73, %c0_74, %c0_75] : memref<2x8x1xf32, #tpu.memory_space<vmem>>, vector<1x8x1xf32>
      %100 = vector.shape_cast %99 : vector<1x8x1xf32> to vector<8x1xf32>
      %101 = tpu.reciprocal %100 {approx = true} : vector<8x1xf32> -> vector<8x1xf32>
      %102 = vector.broadcast %101 : vector<8x1xf32> to vector<8x64xf32>
      %103 = arith.mulf %98, %102 : vector<8x64xf32>
      %104 = tpu.concatenate %96, %103 in 1 : vector<8x64xf32>, vector<8x64xf32> -> vector<8x128xf32>
      %105 = arith.truncf %104 : vector<8x128xf32> to vector<8x128xbf16>
      %c0_76 = arith.constant 0 : index
      %c0_77 = arith.constant 0 : index
      %c0_78 = arith.constant 0 : index
      %106 = vector.load %arg7[%c0_76, %c0_77, %c0_78] : memref<1x8x128xbf16, #tpu.memory_space<vmem>>, vector<1x8x128xbf16>
      %107 = vector.shape_cast %106 : vector<1x8x128xbf16> to vector<8x128xbf16>
      %108 = vector.shape_cast %105 : vector<8x128xbf16> to vector<1x8x128xbf16>
      tpu.vector_store %arg7[%c0_76, %c0_77, %c0_78], %108 {strides = array<i32>} : memref<1x8x128xbf16, #tpu.memory_space<vmem>>, vector<1x8x128xbf16>,
    } else {
    }
    return
  }
  func.func @transform_0(%arg0: i32, %arg1: i32, %arg2: i32) -> (i32, i32, i32) {
    %c0_i32 = arith.constant 0 : i32
    %c0_i32_0 = arith.constant 0 : i32
    return %arg0, %arg1, %c0_i32 : i32, i32, i32
  }
  func.func @transform_1(%arg0: i32, %arg1: i32, %arg2: i32) -> (i32, i32, i32) {
    %c1_i32 = arith.constant 1 : i32
    %c0_i32 = arith.constant 0 : i32
    return %arg0, %arg2, %c1_i32 : i32, i32, i32
  }
  func.func @transform_2(%arg0: i32, %arg1: i32, %arg2: i32) -> (i32, i32, i32) {
    %c2_i32 = arith.constant 2 : i32
    %c0_i32 = arith.constant 0 : i32
    return %arg0, %arg2, %c2_i32 : i32, i32, i32
  }
  func.func @transform_3(%arg0: i32, %arg1: i32, %arg2: i32) -> (i32, i32, i32) {
    %c0_i32 = arith.constant 0 : i32
    %c0_i32_0 = arith.constant 0 : i32
    return %arg0, %c0_i32, %arg2 : i32, i32, i32
  }
  func.func @transform_4(%arg0: i32, %arg1: i32, %arg2: i32) -> (i32, i32, i32) {
    %c0_i32 = arith.constant 0 : i32
    %c0_i32_0 = arith.constant 0 : i32
    return %arg0, %arg1, %c0_i32 : i32, i32, i32
  }
}

module attributes {stable_mosaic.version = 11 : i64} {
  func.func @_ln_matmul_kernel(%arg0: i32, %arg1: i32, %arg2: memref<16x128xbf16, #tpu.memory_space<vmem>>, %arg3: memref<1x128xf32, #tpu.memory_space<vmem>>, %arg4: memref<1x128xf32, #tpu.memory_space<vmem>>, %arg5: memref<128x256xbf16, #tpu.memory_space<vmem>>, %arg6: memref<1x256xf32, #tpu.memory_space<vmem>>, %arg7: memref<16x256xbf16, #tpu.memory_space<vmem>>) attributes {dimension_semantics = [#tpu.dimension_semantics<parallel>, #tpu.dimension_semantics<parallel>], iteration_bounds = array<i64: 1, 1>, scalar_prefetch = 0 : i64, scratch_operands = 0 : i64, tpu.core_type = #tpu.core_type<tc>, window_params = [{transform_indices = @transform_0, window_bounds = array<i64: 16, 128>}, {pipeline_mode = #tpu.pipeline_mode<synchronous>, transform_indices = @transform_1, window_bounds = array<i64: 1, 128>}, {pipeline_mode = #tpu.pipeline_mode<synchronous>, transform_indices = @transform_2, window_bounds = array<i64: 1, 128>}, {transform_indices = @transform_3, window_bounds = array<i64: 128, 256>}, {transform_indices = @transform_4, window_bounds = array<i64: 1, 256>}, {transform_indices = @transform_5, window_bounds = array<i64: 16, 256>}]} {
    %c0 = arith.constant 0 : index
    %c0_0 = arith.constant 0 : index
    %0 = vector.load %arg2[%c0, %c0_0] : memref<16x128xbf16, #tpu.memory_space<vmem>>, vector<16x128xbf16>
    %1 = arith.extf %0 : vector<16x128xbf16> to vector<16x128xf32>
    %cst = arith.constant dense<0.000000e+00> : vector<16xf32>
    %2 = vector.multi_reduction <add>, %1, %cst [1] : vector<16x128xf32> to vector<16xf32>
    %3 = vector.shape_cast %2 : vector<16xf32> to vector<16x1xf32>
    %cst_1 = arith.constant 1.280000e+02 : f32
    %4 = vector.broadcast %cst_1 : f32 to vector<16x1xf32>
    %5 = arith.divf %3, %4 : vector<16x1xf32>
    %6 = vector.broadcast %5 : vector<16x1xf32> to vector<16x128xf32>
    %7 = arith.subf %1, %6 : vector<16x128xf32>
    %8 = arith.mulf %7, %7 : vector<16x128xf32>
    %cst_2 = arith.constant dense<0.000000e+00> : vector<16xf32>
    %9 = vector.multi_reduction <add>, %8, %cst_2 [1] : vector<16x128xf32> to vector<16xf32>
    %10 = vector.shape_cast %9 : vector<16xf32> to vector<16x1xf32>
    %cst_3 = arith.constant 1.280000e+02 : f32
    %11 = vector.broadcast %cst_3 : f32 to vector<16x1xf32>
    %12 = arith.divf %10, %11 : vector<16x1xf32>
    %c0_4 = arith.constant 0 : index
    %c0_5 = arith.constant 0 : index
    %13 = vector.load %arg3[%c0_4, %c0_5] : memref<1x128xf32, #tpu.memory_space<vmem>>, vector<1x128xf32>
    %14 = vector.broadcast %13 : vector<1x128xf32> to vector<16x128xf32>
    %15 = arith.mulf %14, %7 : vector<16x128xf32>
    %cst_6 = arith.constant 9.99999997E-7 : f32
    %16 = vector.broadcast %cst_6 : f32 to vector<16x1xf32>
    %17 = arith.addf %12, %16 : vector<16x1xf32>
    %18 = math.rsqrt %17 : vector<16x1xf32>
    %19 = vector.broadcast %18 : vector<16x1xf32> to vector<16x128xf32>
    %20 = arith.mulf %15, %19 : vector<16x128xf32>
    %c0_7 = arith.constant 0 : index
    %c0_8 = arith.constant 0 : index
    %21 = vector.load %arg4[%c0_7, %c0_8] : memref<1x128xf32, #tpu.memory_space<vmem>>, vector<1x128xf32>
    %22 = vector.broadcast %21 : vector<1x128xf32> to vector<16x128xf32>
    %23 = arith.addf %20, %22 : vector<16x128xf32>
    %24 = arith.truncf %23 : vector<16x128xf32> to vector<16x128xbf16>
    %c0_9 = arith.constant 0 : index
    %c0_10 = arith.constant 0 : index
    %25 = vector.load %arg5[%c0_9, %c0_10] : memref<128x256xbf16, #tpu.memory_space<vmem>>, vector<128x256xbf16>
    %cst_11 = arith.constant dense<0.000000e+00> : vector<16x256xf32>
    %26 = tpu.matmul %24, %25, %cst_11 {dimension_numbers = #tpu.dot_dimension_numbers<[1], [0], [0], [1], [0, 0, 1, 1], [], []>} : vector<16x128xbf16>, vector<128x256xbf16>, vector<16x256xf32> -> vector<16x256xf32>
    %c0_12 = arith.constant 0 : index
    %c0_13 = arith.constant 0 : index
    %27 = vector.load %arg6[%c0_12, %c0_13] : memref<1x256xf32, #tpu.memory_space<vmem>>, vector<1x256xf32>
    %28 = vector.broadcast %27 : vector<1x256xf32> to vector<16x256xf32>
    %29 = arith.addf %26, %28 : vector<16x256xf32>
    %30 = arith.mulf %29, %29 : vector<16x256xf32>
    %31 = arith.mulf %29, %30 : vector<16x256xf32>
    %cst_14 = arith.constant 4.471500e-02 : f32
    %32 = vector.broadcast %cst_14 : f32 to vector<16x256xf32>
    %33 = arith.mulf %32, %31 : vector<16x256xf32>
    %34 = arith.addf %29, %33 : vector<16x256xf32>
    %cst_15 = arith.constant 0.797884583 : f32
    %35 = vector.broadcast %cst_15 : f32 to vector<16x256xf32>
    %36 = arith.mulf %35, %34 : vector<16x256xf32>
    %37 = math.tanh %36 : vector<16x256xf32>
    %cst_16 = arith.constant 1.000000e+00 : f32
    %38 = vector.broadcast %cst_16 : f32 to vector<16x256xf32>
    %39 = arith.addf %38, %37 : vector<16x256xf32>
    %cst_17 = arith.constant 5.000000e-01 : f32
    %40 = vector.broadcast %cst_17 : f32 to vector<16x256xf32>
    %41 = arith.mulf %40, %39 : vector<16x256xf32>
    %42 = arith.mulf %29, %41 : vector<16x256xf32>
    %43 = arith.truncf %42 : vector<16x256xf32> to vector<16x256xbf16>
    %c0_18 = arith.constant 0 : index
    %c0_19 = arith.constant 0 : index
    %44 = vector.load %arg7[%c0_18, %c0_19] : memref<16x256xbf16, #tpu.memory_space<vmem>>, vector<16x256xbf16>
    tpu.vector_store %arg7[%c0_18, %c0_19], %43 {strides = array<i32>} : memref<16x256xbf16, #tpu.memory_space<vmem>>, vector<16x256xbf16>,
    return
  }
  func.func @transform_0(%arg0: i32, %arg1: i32) -> (i32, i32) {
    %c0_i32 = arith.constant 0 : i32
    %c0_i32_0 = arith.constant 0 : i32
    return %arg0, %c0_i32 : i32, i32
  }
  func.func @transform_1(%arg0: i32, %arg1: i32) -> (i32, i32) {
    %c0_i32 = arith.constant 0 : i32
    %c0_i32_0 = arith.constant 0 : i32
    %c0_i32_1 = arith.constant 0 : i32
    return %c0_i32, %c0_i32_0 : i32, i32
  }
  func.func @transform_2(%arg0: i32, %arg1: i32) -> (i32, i32) {
    %c0_i32 = arith.constant 0 : i32
    %c0_i32_0 = arith.constant 0 : i32
    %c0_i32_1 = arith.constant 0 : i32
    return %c0_i32, %c0_i32_0 : i32, i32
  }
  func.func @transform_3(%arg0: i32, %arg1: i32) -> (i32, i32) {
    %c0_i32 = arith.constant 0 : i32
    %c0_i32_0 = arith.constant 0 : i32
    return %c0_i32, %arg1 : i32, i32
  }
  func.func @transform_4(%arg0: i32, %arg1: i32) -> (i32, i32) {
    %c0_i32 = arith.constant 0 : i32
    %c0_i32_0 = arith.constant 0 : i32
    return %c0_i32, %arg1 : i32, i32
  }
  func.func @transform_5(%arg0: i32, %arg1: i32) -> (i32, i32) {
    %c0_i32 = arith.constant 0 : i32
    return %arg0, %arg1 : i32, i32
  }
}

module attributes {stable_mosaic.version = 11 : i64} {
  func.func @_matmul_res_kernel(%arg0: i32, %arg1: i32, %arg2: i32, %arg3: memref<16x256xbf16, #tpu.memory_space<vmem>>, %arg4: memref<256x128xbf16, #tpu.memory_space<vmem>>, %arg5: memref<1x128xf32, #tpu.memory_space<vmem>>, %arg6: memref<16x128xbf16, #tpu.memory_space<vmem>>, %arg7: memref<16x128xbf16, #tpu.memory_space<vmem>>, %arg8: memref<16x128xf32, #tpu.memory_space<vmem>>) attributes {dimension_semantics = [#tpu.dimension_semantics<parallel>, #tpu.dimension_semantics<parallel>, #tpu.dimension_semantics<arbitrary>], iteration_bounds = array<i64: 1, 1, 1>, scalar_prefetch = 0 : i64, scratch_operands = 1 : i64, tpu.core_type = #tpu.core_type<tc>, window_params = [{transform_indices = @transform_0, window_bounds = array<i64: 16, 256>}, {transform_indices = @transform_1, window_bounds = array<i64: 256, 128>}, {transform_indices = @transform_2, window_bounds = array<i64: 1, 128>}, {transform_indices = @transform_3, window_bounds = array<i64: 16, 128>}, {transform_indices = @transform_4, window_bounds = array<i64: 16, 128>}]} {
    %c0_i32 = arith.constant 0 : i32
    %0 = arith.cmpi eq, %arg2, %c0_i32 : i32
    %1 = arith.extui %0 : i1 to i32
    %c0_i32_0 = arith.constant 0 : i32
    %2 = arith.cmpi ne, %1, %c0_i32_0 : i32
    scf.if %2 {
      %cst_10 = arith.constant 0.000000e+00 : f32
      %12 = vector.broadcast %cst_10 : f32 to vector<16x128xf32>
      %c0_11 = arith.constant 0 : index
      %c0_12 = arith.constant 0 : index
      %13 = vector.load %arg8[%c0_11, %c0_12] : memref<16x128xf32, #tpu.memory_space<vmem>>, vector<16x128xf32>
      tpu.vector_store %arg8[%c0_11, %c0_12], %12 {strides = array<i32>} : memref<16x128xf32, #tpu.memory_space<vmem>>, vector<16x128xf32>,
    } else {
    }
    %c0 = arith.constant 0 : index
    %c0_1 = arith.constant 0 : index
    %3 = vector.load %arg8[%c0, %c0_1] : memref<16x128xf32, #tpu.memory_space<vmem>>, vector<16x128xf32>
    %c0_2 = arith.constant 0 : index
    %c0_3 = arith.constant 0 : index
    %4 = vector.load %arg3[%c0_2, %c0_3] : memref<16x256xbf16, #tpu.memory_space<vmem>>, vector<16x256xbf16>
    %c0_4 = arith.constant 0 : index
    %c0_5 = arith.constant 0 : index
    %5 = vector.load %arg4[%c0_4, %c0_5] : memref<256x128xbf16, #tpu.memory_space<vmem>>, vector<256x128xbf16>
    %cst = arith.constant dense<0.000000e+00> : vector<16x128xf32>
    %6 = tpu.matmul %4, %5, %cst {dimension_numbers = #tpu.dot_dimension_numbers<[1], [0], [0], [1], [0, 0, 1, 1], [], []>} : vector<16x256xbf16>, vector<256x128xbf16>, vector<16x128xf32> -> vector<16x128xf32>
    %7 = arith.addf %3, %6 : vector<16x128xf32>
    %c0_6 = arith.constant 0 : index
    %c0_7 = arith.constant 0 : index
    %8 = vector.load %arg8[%c0_6, %c0_7] : memref<16x128xf32, #tpu.memory_space<vmem>>, vector<16x128xf32>
    tpu.vector_store %arg8[%c0_6, %c0_7], %7 {strides = array<i32>} : memref<16x128xf32, #tpu.memory_space<vmem>>, vector<16x128xf32>,
    %c0_i32_8 = arith.constant 0 : i32
    %9 = arith.cmpi eq, %arg2, %c0_i32_8 : i32
    %10 = arith.extui %9 : i1 to i32
    %c0_i32_9 = arith.constant 0 : i32
    %11 = arith.cmpi ne, %10, %c0_i32_9 : i32
    scf.if %11 {
      %c0_10 = arith.constant 0 : index
      %c0_11 = arith.constant 0 : index
      %12 = vector.load %arg8[%c0_10, %c0_11] : memref<16x128xf32, #tpu.memory_space<vmem>>, vector<16x128xf32>
      %c0_12 = arith.constant 0 : index
      %c0_13 = arith.constant 0 : index
      %13 = vector.load %arg5[%c0_12, %c0_13] : memref<1x128xf32, #tpu.memory_space<vmem>>, vector<1x128xf32>
      %14 = vector.broadcast %13 : vector<1x128xf32> to vector<16x128xf32>
      %15 = arith.addf %12, %14 : vector<16x128xf32>
      %c0_14 = arith.constant 0 : index
      %c0_15 = arith.constant 0 : index
      %16 = vector.load %arg6[%c0_14, %c0_15] : memref<16x128xbf16, #tpu.memory_space<vmem>>, vector<16x128xbf16>
      %17 = arith.extf %16 : vector<16x128xbf16> to vector<16x128xf32>
      %18 = arith.addf %15, %17 : vector<16x128xf32>
      %19 = arith.truncf %18 : vector<16x128xf32> to vector<16x128xbf16>
      %c0_16 = arith.constant 0 : index
      %c0_17 = arith.constant 0 : index
      %20 = vector.load %arg7[%c0_16, %c0_17] : memref<16x128xbf16, #tpu.memory_space<vmem>>, vector<16x128xbf16>
      tpu.vector_store %arg7[%c0_16, %c0_17], %19 {strides = array<i32>} : memref<16x128xbf16, #tpu.memory_space<vmem>>, vector<16x128xbf16>,
    } else {
    }
    return
  }
  func.func @transform_0(%arg0: i32, %arg1: i32, %arg2: i32) -> (i32, i32) {
    %c0_i32 = arith.constant 0 : i32
    return %arg0, %arg2 : i32, i32
  }
  func.func @transform_1(%arg0: i32, %arg1: i32, %arg2: i32) -> (i32, i32) {
    %c0_i32 = arith.constant 0 : i32
    return %arg2, %arg1 : i32, i32
  }
  func.func @transform_2(%arg0: i32, %arg1: i32, %arg2: i32) -> (i32, i32) {
    %c0_i32 = arith.constant 0 : i32
    %c0_i32_0 = arith.constant 0 : i32
    return %c0_i32, %arg1 : i32, i32
  }
  func.func @transform_3(%arg0: i32, %arg1: i32, %arg2: i32) -> (i32, i32) {
    %c0_i32 = arith.constant 0 : i32
    return %arg0, %arg1 : i32, i32
  }
  func.func @transform_4(%arg0: i32, %arg1: i32, %arg2: i32) -> (i32, i32) {
    %c0_i32 = arith.constant 0 : i32
    return %arg0, %arg1 : i32, i32
  }
}

module attributes {stable_mosaic.version = 11 : i64} {
  func.func @_mlm_logsoftmax_kernel(%arg0: i32, %arg1: i32, %arg2: memref<16x128xbf16, #tpu.memory_space<vmem>>, %arg3: memref<128x384xbf16, #tpu.memory_space<vmem>>, %arg4: memref<1x384xf32, #tpu.memory_space<vmem>>, %arg5: memref<16x384xf32, #tpu.memory_space<vmem>>, %arg6: memref<16x1xf32, #tpu.memory_space<vmem>>, %arg7: memref<16x1xf32, #tpu.memory_space<vmem>>) attributes {dimension_semantics = [#tpu.dimension_semantics<parallel>, #tpu.dimension_semantics<arbitrary>], iteration_bounds = array<i64: 1, 1>, scalar_prefetch = 0 : i64, scratch_operands = 2 : i64, tpu.core_type = #tpu.core_type<tc>, window_params = [{transform_indices = @transform_0, window_bounds = array<i64: 16, 128>}, {transform_indices = @transform_1, window_bounds = array<i64: 128, 384>}, {transform_indices = @transform_2, window_bounds = array<i64: 1, 384>}, {transform_indices = @transform_3, window_bounds = array<i64: 16, 384>}]} {
    %c0_i32 = arith.constant 0 : i32
    %0 = arith.cmpi eq, %arg1, %c0_i32 : i32
    %1 = arith.extui %0 : i1 to i32
    %c0_i32_0 = arith.constant 0 : i32
    %2 = arith.cmpi ne, %1, %c0_i32_0 : i32
    scf.if %2 {
      %cst_19 = arith.constant 0xFF800000 : f32
      %32 = vector.broadcast %cst_19 : f32 to vector<16x1xf32>
      %c0_20 = arith.constant 0 : index
      %c0_21 = arith.constant 0 : index
      %33 = vector.load %arg6[%c0_20, %c0_21] : memref<16x1xf32, #tpu.memory_space<vmem>>, vector<16x1xf32>
      tpu.vector_store %arg6[%c0_20, %c0_21], %32 {strides = array<i32>} : memref<16x1xf32, #tpu.memory_space<vmem>>, vector<16x1xf32>,
      %cst_22 = arith.constant 0.000000e+00 : f32
      %34 = vector.broadcast %cst_22 : f32 to vector<16x1xf32>
      %c0_23 = arith.constant 0 : index
      %c0_24 = arith.constant 0 : index
      %35 = vector.load %arg7[%c0_23, %c0_24] : memref<16x1xf32, #tpu.memory_space<vmem>>, vector<16x1xf32>
      tpu.vector_store %arg7[%c0_23, %c0_24], %34 {strides = array<i32>} : memref<16x1xf32, #tpu.memory_space<vmem>>, vector<16x1xf32>,
    } else {
    }
    %c0 = arith.constant 0 : index
    %c0_1 = arith.constant 0 : index
    %3 = vector.load %arg2[%c0, %c0_1] : memref<16x128xbf16, #tpu.memory_space<vmem>>, vector<16x128xbf16>
    %c0_2 = arith.constant 0 : index
    %c0_3 = arith.constant 0 : index
    %4 = vector.load %arg3[%c0_2, %c0_3] : memref<128x384xbf16, #tpu.memory_space<vmem>>, vector<128x384xbf16>
    %cst = arith.constant dense<0.000000e+00> : vector<16x384xf32>
    %5 = tpu.matmul %3, %4, %cst {dimension_numbers = #tpu.dot_dimension_numbers<[1], [0], [0], [1], [0, 0, 1, 1], [], []>} : vector<16x128xbf16>, vector<128x384xbf16>, vector<16x384xf32> -> vector<16x384xf32>
    %c0_4 = arith.constant 0 : index
    %c0_5 = arith.constant 0 : index
    %6 = vector.load %arg4[%c0_4, %c0_5] : memref<1x384xf32, #tpu.memory_space<vmem>>, vector<1x384xf32>
    %7 = vector.broadcast %6 : vector<1x384xf32> to vector<16x384xf32>
    %8 = arith.addf %5, %7 : vector<16x384xf32>
    %c384_i32 = arith.constant 384 : i32
    %9 = arith.muli %arg1, %c384_i32 : i32
    %10 = tpu.assume_multiple %9, 384 : i32
    %c0_6 = arith.constant 0 : index
    %11 = arith.index_cast %10 : i32 to index
    %12 = vector.load %arg5[%c0_6, %11] : memref<16x384xf32, #tpu.memory_space<vmem>>, vector<16x384xf32>
    tpu.vector_store %arg5[%c0_6, %11], %8 {strides = array<i32>} : memref<16x384xf32, #tpu.memory_space<vmem>>, vector<16x384xf32>,
    %c0_7 = arith.constant 0 : index
    %c0_8 = arith.constant 0 : index
    %13 = vector.load %arg6[%c0_7, %c0_8] : memref<16x1xf32, #tpu.memory_space<vmem>>, vector<16x1xf32>
    %cst_9 = arith.constant dense<0xFF800000> : vector<16xf32>
    %14 = vector.multi_reduction <maximumf>, %8, %cst_9 [1] : vector<16x384xf32> to vector<16xf32>
    %15 = vector.shape_cast %14 : vector<16xf32> to vector<16x1xf32>
    %16 = arith.maximumf %13, %15 : vector<16x1xf32>
    %c0_10 = arith.constant 0 : index
    %c0_11 = arith.constant 0 : index
    %17 = vector.load %arg7[%c0_10, %c0_11] : memref<16x1xf32, #tpu.memory_space<vmem>>, vector<16x1xf32>
    %18 = arith.subf %13, %16 : vector<16x1xf32>
    %19 = math.exp %18 : vector<16x1xf32>
    %20 = arith.mulf %17, %19 : vector<16x1xf32>
    %21 = vector.broadcast %16 : vector<16x1xf32> to vector<16x384xf32>
    %22 = arith.subf %8, %21 : vector<16x384xf32>
    %23 = math.exp %22 : vector<16x384xf32>
    %cst_12 = arith.constant dense<0.000000e+00> : vector<16xf32>
    %24 = vector.multi_reduction <add>, %23, %cst_12 [1] : vector<16x384xf32> to vector<16xf32>
    %25 = vector.shape_cast %24 : vector<16xf32> to vector<16x1xf32>
    %26 = arith.addf %20, %25 : vector<16x1xf32>
    %c0_13 = arith.constant 0 : index
    %c0_14 = arith.constant 0 : index
    %27 = vector.load %arg7[%c0_13, %c0_14] : memref<16x1xf32, #tpu.memory_space<vmem>>, vector<16x1xf32>
    tpu.vector_store %arg7[%c0_13, %c0_14], %26 {strides = array<i32>} : memref<16x1xf32, #tpu.memory_space<vmem>>, vector<16x1xf32>,
    %c0_15 = arith.constant 0 : index
    %c0_16 = arith.constant 0 : index
    %28 = vector.load %arg6[%c0_15, %c0_16] : memref<16x1xf32, #tpu.memory_space<vmem>>, vector<16x1xf32>
    tpu.vector_store %arg6[%c0_15, %c0_16], %16 {strides = array<i32>} : memref<16x1xf32, #tpu.memory_space<vmem>>, vector<16x1xf32>,
    %c0_i32_17 = arith.constant 0 : i32
    %29 = arith.cmpi eq, %arg1, %c0_i32_17 : i32
    %30 = arith.extui %29 : i1 to i32
    %c0_i32_18 = arith.constant 0 : i32
    %31 = arith.cmpi ne, %30, %c0_i32_18 : i32
    scf.if %31 {
      %c0_19 = arith.constant 0 : index
      %c0_20 = arith.constant 0 : index
      %32 = vector.load %arg6[%c0_19, %c0_20] : memref<16x1xf32, #tpu.memory_space<vmem>>, vector<16x1xf32>
      %c0_21 = arith.constant 0 : index
      %c0_22 = arith.constant 0 : index
      %33 = vector.load %arg7[%c0_21, %c0_22] : memref<16x1xf32, #tpu.memory_space<vmem>>, vector<16x1xf32>
      %34 = math.log %33 : vector<16x1xf32>
      %35 = arith.addf %32, %34 : vector<16x1xf32>
      %c0_23 = arith.constant 0 : index
      %c0_24 = arith.constant 0 : index
      %36 = vector.load %arg5[%c0_23, %c0_24] : memref<16x384xf32, #tpu.memory_space<vmem>>, vector<16x384xf32>
      %37 = vector.broadcast %35 : vector<16x1xf32> to vector<16x384xf32>
      %38 = arith.subf %36, %37 : vector<16x384xf32>
      %c0_25 = arith.constant 0 : index
      %c0_26 = arith.constant 0 : index
      %39 = vector.load %arg5[%c0_25, %c0_26] : memref<16x384xf32, #tpu.memory_space<vmem>>, vector<16x384xf32>
      tpu.vector_store %arg5[%c0_25, %c0_26], %38 {strides = array<i32>} : memref<16x384xf32, #tpu.memory_space<vmem>>, vector<16x384xf32>,
    } else {
    }
    return
  }
  func.func @transform_0(%arg0: i32, %arg1: i32) -> (i32, i32) {
    %c0_i32 = arith.constant 0 : i32
    %c0_i32_0 = arith.constant 0 : i32
    return %arg0, %c0_i32 : i32, i32
  }
  func.func @transform_1(%arg0: i32, %arg1: i32) -> (i32, i32) {
    %c0_i32 = arith.constant 0 : i32
    %c0_i32_0 = arith.constant 0 : i32
    return %c0_i32, %arg1 : i32, i32
  }
  func.func @transform_2(%arg0: i32, %arg1: i32) -> (i32, i32) {
    %c0_i32 = arith.constant 0 : i32
    %c0_i32_0 = arith.constant 0 : i32
    return %c0_i32, %arg1 : i32, i32
  }
  func.func @transform_3(%arg0: i32, %arg1: i32) -> (i32, i32) {
    %c0_i32 = arith.constant 0 : i32
    %c0_i32_0 = arith.constant 0 : i32
    return %arg0, %c0_i32 : i32, i32
  }
}

</mosaic_0001>

<bundles_post_ra>
// kernel: bert_lm_lss_forward.13
= control target key start
LH: loop header
LB: loop body
LE: loop exit
PB: predicated region body
PF: predicated region fallthrough
CT: control target
= control target key end

     0   :  { %s256_s1 = inlined_call_operand.vmem [shape: bf16[128,128], index: 1, kind: input, shape index: {}]   ;;  %s257_s2 = inlined_call_operand.vmem [shape: f32[1,128], index: 2, kind: input, shape index: {}]   ;;  %s258_s0 = inlined_call_operand.vmem [shape: bf16[16,128], index: 0, kind: input, shape index: {}]   ;;  %s259_s3 = inlined_call_operand.vmem [shape: bf16[16,128], index: 3, kind: input, shape index: {}]   ;;  %s260_s4 = inlined_call_operand.vmem [shape: bf16[16,128], index: 4, kind: output, shape index: {}]  }
   0x1   :  { %v184_v0 = vld [vmem:[%s256_s1 + $0x38] sm:$0xff]  ;;  %v183_v1 = vld [vmem:[%s256_s1 + $0x30] sm:$0xff]  ;;  %v182_v2 = vld [vmem:[%s256_s1 + $0x28] sm:$0xff] }
   0x2   :  { %97 = vmatpush.bf16.msra.mxu0 %v184_v0  ;;  %v181_v3 = vld [vmem:[%s256_s1 + $0x20] sm:$0xff]  ;;  %v180_v4 = vld [vmem:[%s256_s1 + $0x18] sm:$0xff]  ;;  %v179_v5 = vld [vmem:[%s256_s1 + $0x10] sm:$0xff] }
   0x3   :  { %v178_v6 = vld [vmem:[%s256_s1 + $0x8] sm:$0xff]  ;;  %v177_v7 = vld [vmem:[%s256_s1] sm:$0xff] }
   0x4   :  { %v176_v8 = vld [vmem:[%s258_s0] sm:$0xff] }
   0x5   :  { %v194_v10 = vld [vmem:[%s257_s2] ss:$0 sm:$0xff] }
   0x6   :  { %98 = vmatpush.bf16.msra.mxu0 %v183_v1  ;;  %v186_v11 = vld [vmem:[%s259_s3] sm:$0xff]  }
   0x7   :  { %v187_v13 = vunpack.c.l.bf16 %v186_v11  ;;  %v188_v14 = vunpack.c.h.bf16 %v186_v11 }
   0xa   :  { %99 = vmatpush.bf16.msra.mxu0 %v182_v2 }
   0xe   :  { %100 = vmatpush.bf16.msra.mxu0 %v181_v3 }
  0x12   :  { %101 = vmatpush.bf16.msra.mxu0 %v180_v4 }
  0x16   :  { %102 = vmatpush.bf16.msra.mxu0 %v179_v5 }
  0x1a   :  { %103 = vmatpush.bf16.msra.mxu0 %v178_v6 }
  0x1e   :  { %104 = vmatpush.bf16.msra.mxu0 %v177_v7 }
  0x21   :  { %105 = vmatmul.bf16.vlgmr.msra.gmra.mxu0 %v176_v8 }
  0x9e   :  { %v106_v9 = vpop.f32.mrf.mxu0 }
  0x9f   :  { %v124_v12 = vadd.f32 %v194_v10, %v106_v9 }
  0xa1   :  { %v130_v17 = vadd.f32 %v187_v13, %v124_v12 }
  0xa6   :  { %v108_v15 = vpop.f32.mrf.mxu0 }
  0xa7   :  { %v125_v16 = vadd.f32 %v194_v10, %v108_v15 }
  0xa9   :  { %v131_v18 = vadd.f32 %v188_v14, %v125_v16 }
  0xab   :  { %v192_v19 = vpack.c.bf16 %v131_v18, %v130_v17 }
  0xad   :  { %193 = vst [vmem:[%s260_s4] sm:$0xff] %v192_v19  }

// kernel: bert_lm_lss_forward.14
= control target key start
LH: loop header
LB: loop body
LE: loop exit
PB: predicated region body
PF: predicated region fallthrough
CT: control target
= control target key end

     0   :  { %v359_v3 = vmov 128.0   ;;  %s520_s0 = inlined_call_operand.vmem [shape: bf16[16,128], index: 0, kind: input, shape index: {}]   ;;  %s521_s1 = inlined_call_operand.vmem [shape: f32[1,128], index: 1, kind: input, shape index: {}]   ;;  %s522_s2 = inlined_call_operand.vmem [shape: f32[1,128], index: 2, kind: input, shape index: {}]   ;;  %s523_s3 = inlined_call_operand.vmem [shape: bf16[128,256], index: 3, kind: input, shape index: {}]   ;;  %s524_s4 = inlined_call_operand.vmem [shape: f32[1,256], index: 4, kind: input, shape index: {}]   ;;  %s525_s5 = inlined_call_operand.vmem [shape: bf16[16,256], index: 5, kind: output, shape index: {}]  }
   0x1   :  { %v339_v0 = vld [vmem:[%s520_s0] sm:$0xff]   ;;  %345 = vrcp.f32 %v359_v3  ;;  %v316_v18 = vld [vmem:[%s523_s3 + $0x70] sm:$0xf]  ;;  %v337_v19 = vld [vmem:[%s523_s3 + $0x74] sm:$0xf0] }
   0x2   :  { %v340_v1 = vunpack.c.l.bf16 %v339_v0  ;;  %v341_v2 = vunpack.c.h.bf16 %v339_v0  ;;  %v336_v20 = vld [vmem:[%s523_s3 + $0x74] sm:$0xf]  ;;  %v317_v21 = vor.u32 %v337_v19, %v316_v18  ;;  %v318_v22 = vld [vmem:[%s523_s3 + $0x78] sm:$0xf0]  ;;  %v308_v24 = vld [vmem:[%s523_s3 + $0x60] sm:$0xf] }
   0x3   :  { %v321_v23 = vor.u32 %v336_v20, %v318_v22  ;;  %v335_v25 = vld [vmem:[%s523_s3 + $0x64] sm:$0xf0]  ;;  %v334_v26 = vld [vmem:[%s523_s3 + $0x64] sm:$0xf]  ;;  %v310_v28 = vld [vmem:[%s523_s3 + $0x68] sm:$0xf0] }
   0x4   :  { %24 = vadd.xlane.f32.xlu0 %v340_v1  ;;  %186 = vmatpush.bf16.msra.mxu0 %v317_v21  ;;  %v309_v27 = vor.u32 %v335_v25, %v308_v24  ;;  %v313_v29 = vor.u32 %v334_v26, %v310_v28  ;;  %v300_v30 = vld [vmem:[%s523_s3 + $0x50] sm:$0xf]  ;;  %v333_v31 = vld [vmem:[%s523_s3 + $0x54] sm:$0xf0]  ;;  %v332_v32 = vld [vmem:[%s523_s3 + $0x54] sm:$0xf] }
   0x5   :  { %200 = vmatpush.bf16.msra.mxu1 %v321_v23  ;;  %v301_v33 = vor.u32 %v333_v31, %v300_v30  ;;  %v302_v34 = vld [vmem:[%s523_s3 + $0x58] sm:$0xf0]  ;;  %v292_v36 = vld [vmem:[%s523_s3 + $0x40] sm:$0xf]  ;;  %v331_v37 = vld [vmem:[%s523_s3 + $0x44] sm:$0xf0] }
   0x6   :  { %v305_v35 = vor.u32 %v332_v32, %v302_v34  ;;  %v330_v38 = vld [vmem:[%s523_s3 + $0x44] sm:$0xf]  ;;  %v293_v39 = vor.u32 %v331_v37, %v292_v36  ;;  %v294_v40 = vld [vmem:[%s523_s3 + $0x48] sm:$0xf0]  ;;  %v284_v42 = vld [vmem:[%s523_s3 + $0x30] sm:$0xf] }
   0x7   :  { %v346_v4 = vpop.eup %345  ;;  %v297_v41 = vor.u32 %v330_v38, %v294_v40  ;;  %v329_v43 = vld [vmem:[%s523_s3 + $0x34] sm:$0xf0]  ;;  %v328_v44 = vld [vmem:[%s523_s3 + $0x34] sm:$0xf]  ;;  %v286_v46 = vld [vmem:[%s523_s3 + $0x38] sm:$0xf0] }
   0x8   :  { %v29_v5 = vmul.f32 128.0, %v346_v4  ;;  %vm33_vm0 = vweird.f32 %v346_v4  ;;  %187 = vmatpush.bf16.msra.mxu0 %v309_v27  ;;  %v285_v45 = vor.u32 %v329_v43, %v284_v42  ;;  %v289_v47 = vor.u32 %v328_v44, %v286_v46  ;;  %v276_v48 = vld [vmem:[%s523_s3 + $0x20] sm:$0xf]  ;;  %v327_v49 = vld [vmem:[%s523_s3 + $0x24] sm:$0xf0] }
   0x9   :  { %201 = vmatpush.bf16.msra.mxu1 %v313_v29  ;;  %v326_v50 = vld [vmem:[%s523_s3 + $0x24] sm:$0xf]  ;;  %v277_v51 = vor.u32 %v327_v49, %v276_v48  ;;  %v278_v52 = vld [vmem:[%s523_s3 + $0x28] sm:$0xf0]  ;;  %v268_v54 = vld [vmem:[%s523_s3 + $0x10] sm:$0xf] }
   0xa   :  { %v30_v6 = vsub.f32 1.0, %v29_v5  ;;  %v281_v53 = vor.u32 %v326_v50, %v278_v52  ;;  %v325_v55 = vld [vmem:[%s523_s3 + $0x14] sm:$0xf0]  ;;  %v324_v56 = vld [vmem:[%s523_s3 + $0x14] sm:$0xf] }
   0xb   :  { %v269_v57 = vor.u32 %v325_v55, %v268_v54  ;;  %v270_v58 = vld [vmem:[%s523_s3 + $0x18] sm:$0xf0]  ;;  %v260_v59 = vld [vmem:[%s523_s3] sm:$0xf]  ;;  %v323_v60 = vld [vmem:[%s523_s3 + $0x4] sm:$0xf0] }
   0xc   :  { %26 = vadd.xlane.f32.xlu0 %v341_v2  ;;  %v31_v7 = vmul.f32 %v346_v4, %v30_v6  ;;  %188 = vmatpush.bf16.msra.mxu0 %v301_v33  ;;  %v273_v61 = vor.u32 %v324_v56, %v270_v58  ;;  %v322_v62 = vld [vmem:[%s523_s3 + $0x4] sm:$0xf]  ;;  %v262_v63 = vld [vmem:[%s523_s3 + $0x8] sm:$0xf0]  ;;  %v261_v0 = vor.u32 %v323_v60, %v260_v59  ;;  %v343_v20 = vld [vmem:[%s521_s1] ss:$0 sm:$0xff] }
   0xd   :  { %202 = vmatpush.bf16.msra.mxu1 %v305_v35  ;;  %v344_v27 = vld [vmem:[%s522_s2] ss:$0 sm:$0xff] }
   0xe   :  { %v32_v8 = vadd.f32 %v346_v4, %v31_v7 }
  0x10   :  { %v393_v9 = vsel %vm33_vm0, %v346_v4, %v32_v8  ;;  %189 = vmatpush.bf16.msra.mxu0 %v293_v39 }
  0x11   :  { %203 = vmatpush.bf16.msra.mxu1 %v297_v41 }
  0x14   :  { %190 = vmatpush.bf16.msra.mxu0 %v285_v45 }
  0x15   :  { %204 = vmatpush.bf16.msra.mxu1 %v289_v47 }
  0x18   :  { %191 = vmatpush.bf16.msra.mxu0 %v277_v51 }
  0x19   :  { %205 = vmatpush.bf16.msra.mxu1 %v281_v53 }
  0x1c   :  { %192 = vmatpush.bf16.msra.mxu0 %v269_v57 }
  0x1d   :  { %206 = vmatpush.bf16.msra.mxu1 %v273_v61 }
  0x20   :  { %193 = vmatpush.bf16.msra.mxu0 %v261_v0 }
  0x77   :  { %v25_v10 = vpop.xlane.xlu0 %24 }
  0x78   :  { %v35_v11 = vmul.f32 %v393_v9, %v25_v10 }
  0x7a   :  { %v396_v12 = vsub.f32 %v340_v1, %v35_v11  ;;  %v265_v1 = vor.u32 %v322_v62, %v262_v63 }
  0x7c   :  { %v39_v13 = vmul.f32 %v396_v12, %v396_v12  ;;  %207 = vmatpush.bf16.msra.mxu1 %v265_v1  ;;  %v51_v23 = vmul.f32 %v343_v20, %v396_v12  ;;  %v100_v12 = vld [vmem:[%s524_s4] sm:$0x3] }
  0x7d   :  { %v102_v33 = vperm.slane %v100_v12, 0  ;;  %v103_v34 = vperm.slane %v100_v12, 1 }
  0x7e   :  { %41 = vadd.xlane.f32.xlu1 %v39_v13 }
  0x7f   :  { %v27_v14 = vpop.xlane.xlu0 %26 }
  0x80   :  { %v36_v15 = vmul.f32 %v393_v9, %v27_v14 }
  0x82   :  { %v401_v16 = vsub.f32 %v341_v2, %v36_v15 }
  0x84   :  { %v40_v17 = vmul.f32 %v401_v16, %v401_v16  ;;  %v52_v25 = vmul.f32 %v343_v20, %v401_v16 }
  0x86   :  { %43 = vadd.xlane.f32.xlu1 %v40_v17 }
  0xf1   :  { %v42_v2 = vpop.xlane.xlu1 %41 }
  0xf2   :  { %v45_v3 = vmul.f32 %v42_v2, %v393_v9 }
  0xf4   :  { %v53_v4 = vadd.f32 1e-06, %v45_v3 }
  0xf6   :  { %347 = vrsqrt.f32 %v53_v4  ;;  %vm61_vm2 = vweird.f32 %v53_v4 }
  0xf9   :  { %v44_v5 = vpop.xlane.xlu1 %43 }
  0xfa   :  { %v46_v6 = vmul.f32 %v44_v5, %v393_v9 }
  0xfc   :  { %v348_v7 = vpop.eup %347  ;;  %v54_v8 = vadd.f32 1e-06, %v46_v6 }
  0xfd   :  { %v56_v10 = vmul.f32 %v348_v7, %v53_v4  ;;  %vm62_vm1 = vweird.f32 %v348_v7 }
  0xfe   :  { %349 = vrsqrt.f32 %v54_v8  ;;  %vm63_vm3 = vmor %vm61_vm2, %vm62_vm1  ;;  %vm71_vm5 = vweird.f32 %v54_v8 }
  0xff   :  { %v57_v11 = vmul.f32 %v348_v7, %v56_v10 }
 0x101   :  { %v58_v13 = vmul.f32 0.5, %v57_v11 }
 0x103   :  { %v59_v14 = vsub.f32 1.5, %v58_v13 }
 0x104   :  { %v350_v15 = vpop.eup %349 }
 0x105   :  { %v66_v17 = vmul.f32 %v350_v15, %v54_v8  ;;  %v60_v18 = vmul.f32 %v348_v7, %v59_v14  ;;  %vm72_vm4 = vweird.f32 %v350_v15 }
 0x106   :  { %vm73_vm6 = vmor %vm71_vm5, %vm72_vm4 }
 0x107   :  { %v67_v19 = vmul.f32 %v350_v15, %v66_v17  ;;  %v64_v22 = vsel %vm63_vm3, %v348_v7, %v60_v18 }
 0x108   :  { %v75_v26 = vmul.f32 %v64_v22, %v51_v23 }
 0x109   :  { %v68_v21 = vmul.f32 0.5, %v67_v19 }
 0x10a   :  { %v81_v30 = vadd.f32 %v344_v27, %v75_v26 }
 0x10b   :  { %v69_v9 = vsub.f32 1.5, %v68_v21 }
 0x10d   :  { %v70_v24 = vmul.f32 %v350_v15, %v69_v9 }
 0x10f   :  { %v74_v28 = vsel %vm73_vm6, %v350_v15, %v70_v24 }
 0x110   :  { %v76_v29 = vmul.f32 %v74_v28, %v52_v25 }
 0x112   :  { %v82_v31 = vadd.f32 %v344_v27, %v76_v29 }
 0x114   :  { %v83_v32 = vpack.c.bf16 %v82_v31, %v81_v30 }
 0x116   :  { %194 = vmatmul.bf16.vlgmr.msra.gmra.mxu0 %v83_v32  ;;  %208 = vmatmul.bf16.vlgmr.msra.gmra.mxu1 %v83_v32 }
 0x193   :  { %v195_v16 = vpop.f32.mrf.mxu0  ;;  %v209_v35 = vpop.f32.mrf.mxu1 }
 0x194   :  { %v196_v36 = vadd.f32 %v195_v16, %v102_v33  ;;  %v210_v37 = vadd.f32 %v209_v35, %v103_v34 }
 0x196   :  { %v214_v38 = vmul.f32 %v196_v36, %v196_v36  ;;  %v215_v39 = vmul.f32 %v210_v37, %v210_v37 }
 0x198   :  { %v218_v40 = vmul.f32 %v214_v38, %v196_v36  ;;  %v219_v41 = vmul.f32 %v215_v39, %v210_v37 }
 0x19a   :  { %v222_v42 = vmul.f32 0.044715, %v218_v40  ;;  %v223_v43 = vmul.f32 0.044715, %v219_v41 }
 0x19b   :  { %v197_v44 = vpop.f32.mrf.mxu0  ;;  %v211_v45 = vpop.f32.mrf.mxu1 }
 0x19c   :  { %v226_v46 = vadd.f32 %v222_v42, %v196_v36  ;;  %v227_v47 = vadd.f32 %v223_v43, %v210_v37  ;;  %v198_v48 = vadd.f32 %v197_v44, %v102_v33  ;;  %v212_v49 = vadd.f32 %v211_v45, %v103_v34 }
 0x19e   :  { %v230_v50 = vmul.f32 0.7978846, %v226_v46  ;;  %v231_v51 = vmul.f32 0.7978846, %v227_v47  ;;  %v216_v52 = vmul.f32 %v198_v48, %v198_v48  ;;  %v217_v53 = vmul.f32 %v212_v49, %v212_v49 }
 0x1a0   :  { %351 = vtanh.f32 %v230_v50  ;;  %v220_v54 = vmul.f32 %v216_v52, %v198_v48  ;;  %v221_v55 = vmul.f32 %v217_v53, %v212_v49 }
 0x1a1   :  { %353 = vtanh.f32 %v231_v51 }
 0x1a2   :  { %v224_v56 = vmul.f32 0.044715, %v220_v54  ;;  %v225_v57 = vmul.f32 0.044715, %v221_v55 }
 0x1a4   :  { %v228_v58 = vadd.f32 %v224_v56, %v198_v48  ;;  %v229_v59 = vadd.f32 %v225_v57, %v212_v49 }
 0x1a6   :  { %v352_v60 = vpop.eup %351  ;;  %v232_v61 = vmul.f32 0.7978846, %v228_v58  ;;  %v233_v62 = vmul.f32 0.7978846, %v229_v59 }
 0x1a7   :  { %v354_v63 = vpop.eup %353  ;;  %v238_v0 = vadd.f32 1.0, %v352_v60 }
 0x1a8   :  { %v239_v1 = vadd.f32 1.0, %v354_v63  ;;  %355 = vtanh.f32 %v232_v61 }
 0x1a9   :  { %v242_v2 = vmul.f32 0.5, %v238_v0  ;;  %357 = vtanh.f32 %v233_v62 }
 0x1aa   :  { %v243_v3 = vmul.f32 0.5, %v239_v1 }
 0x1ab   :  { %v246_v4 = vmul.f32 %v242_v2, %v196_v36 }
 0x1ac   :  { %v247_v5 = vmul.f32 %v243_v3, %v210_v37 }
 0x1ae   :  { %v356_v6 = vpop.eup %355  ;;  %v250_v7 = vpack.c.bf16 %v247_v5, %v246_v4 }
 0x1af   :  { %v358_v8 = vpop.eup %357  ;;  %v240_v10 = vadd.f32 1.0, %v356_v6 }
 0x1b0   :  { %252 = vst [vmem:[%s525_s5] sm:$0xff] %v250_v7  ;;  %v241_v11 = vadd.f32 1.0, %v358_v8 }
 0x1b1   :  { %v244_v13 = vmul.f32 0.5, %v240_v10 }
 0x1b2   :  { %v245_v14 = vmul.f32 0.5, %v241_v11 }
 0x1b3   :  { %v248_v15 = vmul.f32 %v244_v13, %v198_v48 }
 0x1b4   :  { %v249_v17 = vmul.f32 %v245_v14, %v212_v49 }
 0x1b6   :  { %v251_v18 = vpack.c.bf16 %v249_v17, %v248_v15 }
 0x1b8   :  { %253 = vst [vmem:[%s525_s5 + $0x8] sm:$0xff] %v251_v18 }

// kernel: bert_lm_lss_forward.11
= control target key start
LH: loop header
LB: loop body
LE: loop exit
PB: predicated region body
PF: predicated region fallthrough
CT: control target
= control target key end

     0   :  { %s936_s18 = smov 0   ;;  %s938_s19 = smov 0   ;;  %s1093_s0 = inlined_call_operand.vmem [shape: bf16[16,128], index: 0, kind: input, shape index: {}]   ;;  %s1094_s1 = inlined_call_operand.vmem [shape: f32[1,128], index: 1, kind: input, shape index: {}]   ;;  %s1095_s2 = inlined_call_operand.vmem [shape: f32[1,128], index: 2, kind: input, shape index: {}]   ;;  %s1096_s3 = inlined_call_operand.vmem [shape: bf16[128,512], index: 3, kind: input, shape index: {}]   ;;  %s1097_s4 = inlined_call_operand.vmem [shape: f32[1,512], index: 4, kind: input, shape index: {}]   ;;  %s1098_s5 = inlined_call_operand.vmem [shape: bf16[16,512], index: 5, kind: output, shape index: {}]  }
   0x1   :  { %s940_s20 = smov 0   ;;  %s942_s21 = smov 0  }
   0x2   :  { %s944_s22 = smov 0  }
   0x3 LB: > { %s24_s23 = sadd.s32 1, %s899_s21  ;;  %s713_s24 = sadd.s32 4294967295, %s903_s22   ;;  %s903_s22 = sphi %s944_s22, %s15_s22   ;;  %s899_s21 = sphi %s942_s21, %s1103_s21   ;;  %s895_s20 = sphi %s940_s20, %s1102_s20   ;;  %s891_s19 = sphi %s938_s19, %s1101_s19   ;;  %s887_s18 = sphi %s936_s18, %s1100_s18  }
   0x4   : > { %p25_p0 = scmp.ge.s32.totalorder %s24_s23, 2  ;;  %p109_p1 = scmp.ne.s32.totalorder %s891_s19, %s887_s18 }
   0x5   : > { %p110_p2 = scmp.eq.s32.totalorder %s903_s22, 0  ;;  %p167_p4 = scmp.eq.s32.totalorder %s713_s24, 1 }
   0x6   : > { %s1105_s23 = smov (%p25_p0, %s24_s23), 0  ;;  %s102_s26 = sadd.s32 1, %s891_s19 }
   0x7   : > { %p111_p3 = por %p110_p2, %p109_p1  ;;  %s99_s25 = ssub.s32 %s899_s21, %s1105_s23 }
   0x8   : > { %p100_p5 = scmp.eq.s32.totalorder %s99_s25, 0  ;;  %p971_p6 = por %p167_p4, %p109_p1 }
   0x9   : > { %p717_p7 = scmp.ge.s32.totalorder %s903_s22, 2 }
   0xa   : > { %s976_s28 = scalar_select %p100_p5, %s891_s19, %s102_s26  }
   0xb   : > { %204 = sbr.rel (%p717_p7) target bundleno = 36 (0x24), region = 28 }
  0x10   : > { %207 = sbr.rel (!%p111_p3) target bundleno = 36 (0x24), region = 32  ;;  %s209_s29 = sand.u32 (%p111_p3), 1, %s891_s19  }
  0x11   : > { %s794_s30 = sshll.u32 (%p111_p3), %s899_s21, 3  ;;  %s718_s6 = sshll.u32 (%p111_p3), %s209_s29, 7 }
  0x12   : > { %s984_s9 = scalar_lea.vmem (%p111_p3), %s1096_s3, %s794_s30  ;;  %s211_s10 = scalar_lea.vmem (%p111_p3), [#allocation2], %s718_s6 }
  0x13   : > { %v273_v0 = vld [vmem:[%s984_s9] sm:$0xff] (%p111_p3)  ;;  %v275_v1 = vld [vmem:[%s984_s9 + $0x10] sm:$0xff] (%p111_p3) }
  0x14   : > { %v277_v2 = vld [vmem:[%s984_s9 + $0x20] sm:$0xff] (%p111_p3)  ;;  %274 = vst [vmem:[%s211_s10] sm:$0xff] (%p111_p3), %v273_v0  ;;  %v279_v3 = vld [vmem:[%s984_s9 + $0x30] sm:$0xff] (%p111_p3) }
  0x15   : > { %276 = vst [vmem:[%s211_s10 + $0x8] sm:$0xff] %v275_v1  ;;  %v281_v4 = vld [vmem:[%s984_s9 + $0x40] sm:$0xff]  ;;  %v283_v5 = vld [vmem:[%s984_s9 + $0x50] sm:$0xff] }
  0x16   : > { %278 = vst [vmem:[%s211_s10 + $0x10] sm:$0xff] %v277_v2  ;;  %v285_v6 = vld [vmem:[%s984_s9 + $0x60] sm:$0xff]  ;;  %v287_v7 = vld [vmem:[%s984_s9 + $0x70] sm:$0xff] }
  0x17   : > { %280 = vst [vmem:[%s211_s10 + $0x18] sm:$0xff] %v279_v3  ;;  %v289_v8 = vld [vmem:[%s984_s9 + $0x80] sm:$0xff]  ;;  %v291_v9 = vld [vmem:[%s984_s9 + $0x90] sm:$0xff] }
  0x18   : > { %282 = vst [vmem:[%s211_s10 + $0x20] sm:$0xff] %v281_v4  ;;  %v293_v10 = vld [vmem:[%s984_s9 + $0xa0] sm:$0xff]  ;;  %v295_v11 = vld [vmem:[%s984_s9 + $0xb0] sm:$0xff] }
  0x19   : > { %284 = vst [vmem:[%s211_s10 + $0x28] sm:$0xff] %v283_v5  ;;  %v297_v12 = vld [vmem:[%s984_s9 + $0xc0] sm:$0xff]  ;;  %v299_v13 = vld [vmem:[%s984_s9 + $0xd0] sm:$0xff] }
  0x1a   : > { %286 = vst [vmem:[%s211_s10 + $0x30] sm:$0xff] %v285_v6  ;;  %v301_v14 = vld [vmem:[%s984_s9 + $0xe0] sm:$0xff]  ;;  %v303_v15 = vld [vmem:[%s984_s9 + $0xf0] sm:$0xff] }
  0x1b   : > { %288 = vst [vmem:[%s211_s10 + $0x38] sm:$0xff] %v287_v7 }
  0x1c   : > { %290 = vst [vmem:[%s211_s10 + $0x40] sm:$0xff] %v289_v8 }
  0x1d   : > { %292 = vst [vmem:[%s211_s10 + $0x48] sm:$0xff] %v291_v9 }
  0x1e   : > { %294 = vst [vmem:[%s211_s10 + $0x50] sm:$0xff] %v293_v10 }
  0x1f   : > { %296 = vst [vmem:[%s211_s10 + $0x58] sm:$0xff] %v295_v11 }
  0x20   : > { %298 = vst [vmem:[%s211_s10 + $0x60] sm:$0xff] %v297_v12 }
  0x21   : > { %300 = vst [vmem:[%s211_s10 + $0x68] sm:$0xff] %v299_v13 }
  0x22   : > { %302 = vst [vmem:[%s211_s10 + $0x70] sm:$0xff] %v301_v14 }
  0x23   : > { %304 = vst [vmem:[%s211_s10 + $0x78] sm:$0xff] %v303_v15 }
  0x24 PF: > { %p721_p8 = scmp.ge.s32.totalorder %s903_s22, 1  ;;  %p317_p9 = scmp.lt.s32.totalorder %s903_s22, 3 }
  0x26   : > { %p318_p10 = pnand %p721_p8, %p317_p9 }
  0x27   : > { %s324_s13 = sand.u32 (!%p318_p10), 1, %s887_s18   ;;  %s724_s26 = sshll.u32 (!%p318_p10), %s895_s20, 1 }
  0x28   : > { %321 = sbr.rel (%p318_p10) target bundleno = 469 (0x1d5), region = 74  ;;  %s722_s14 = sshll.u32 (!%p318_p10), %s324_s13, 7 }
  0x29   : > { %s1022_s15 = scalar_lea.vmem (!%p318_p10), [#allocation2], %s722_s14  ;;  %p367_p11 = scmp.lt.s32.totalorder (!%p318_p10), %s724_s26, 3 }
  0x2a   : > { %s723_s7 = sshll.u32 (!%p318_p10), %s324_s13, 4 }
  0x2b   : > { %s358_s8 = scalar_lea.vmem (!%p318_p10), [#allocation3], %s723_s7 }
  0x2d   : > { %v813_v16 = vld [vmem:[%s1093_s0] sm:$0xff]   ;;  %v905_v19 = vmov 128.0   ;;  %v783_v34 = vld [vmem:[%s1022_s15 + $0x70] sm:$0xf]  ;;  %v810_v35 = vld [vmem:[%s1022_s15 + $0x74] sm:$0xf0] }
  0x2e   : > { %v814_v17 = vunpack.c.l.bf16 %v813_v16  ;;  %v815_v18 = vunpack.c.h.bf16 %v813_v16  ;;  %859 = vrcp.f32 %v905_v19  ;;  %v809_v36 = vld [vmem:[%s1022_s15 + $0x74] sm:$0xf]  ;;  %v784_v37 = vor.u32 %v810_v35, %v783_v34  ;;  %v785_v38 = vld [vmem:[%s1022_s15 + $0x78] sm:$0xf0]  ;;  %v775_v40 = vld [vmem:[%s1022_s15 + $0x60] sm:$0xf] }
  0x2f   : > { %v788_v39 = vor.u32 %v809_v36, %v785_v38  ;;  %v808_v41 = vld [vmem:[%s1022_s15 + $0x64] sm:$0xf0]  ;;  %v807_v42 = vld [vmem:[%s1022_s15 + $0x64] sm:$0xf]  ;;  %v777_v44 = vld [vmem:[%s1022_s15 + $0x68] sm:$0xf0] }
  0x30   : > { %377 = vadd.xlane.f32.xlu0 %v814_v17  ;;  %539 = vmatpush.bf16.msra.mxu0 %v784_v37  ;;  %v776_v43 = vor.u32 %v808_v41, %v775_v40  ;;  %v780_v45 = vor.u32 %v807_v42, %v777_v44  ;;  %v767_v46 = vld [vmem:[%s1022_s15 + $0x50] sm:$0xf]  ;;  %v806_v47 = vld [vmem:[%s1022_s15 + $0x54] sm:$0xf0]  ;;  %v805_v48 = vld [vmem:[%s1022_s15 + $0x54] sm:$0xf] }
  0x31   : > { %553 = vmatpush.bf16.msra.mxu1 %v788_v39  ;;  %v768_v49 = vor.u32 %v806_v47, %v767_v46  ;;  %v769_v50 = vld [vmem:[%s1022_s15 + $0x58] sm:$0xf0]  ;;  %v759_v52 = vld [vmem:[%s1022_s15 + $0x40] sm:$0xf]  ;;  %v804_v53 = vld [vmem:[%s1022_s15 + $0x44] sm:$0xf0] }
  0x32   : > { %v772_v51 = vor.u32 %v805_v48, %v769_v50  ;;  %v803_v54 = vld [vmem:[%s1022_s15 + $0x44] sm:$0xf]  ;;  %v760_v55 = vor.u32 %v804_v53, %v759_v52  ;;  %v761_v56 = vld [vmem:[%s1022_s15 + $0x48] sm:$0xf0]  ;;  %v751_v58 = vld [vmem:[%s1022_s15 + $0x30] sm:$0xf] }
  0x33   : > { %v764_v57 = vor.u32 %v803_v54, %v761_v56  ;;  %v802_v59 = vld [vmem:[%s1022_s15 + $0x34] sm:$0xf0]  ;;  %v801_v60 = vld [vmem:[%s1022_s15 + $0x34] sm:$0xf]  ;;  %v753_v62 = vld [vmem:[%s1022_s15 + $0x38] sm:$0xf0] }
  0x34   : > { %v860_v20 = vpop.eup %859  ;;  %540 = vmatpush.bf16.msra.mxu0 %v776_v43  ;;  %v752_v61 = vor.u32 %v802_v59, %v751_v58  ;;  %v756_v63 = vor.u32 %v801_v60, %v753_v62  ;;  %v743_v0 = vld [vmem:[%s1022_s15 + $0x20] sm:$0xf]  ;;  %v800_v1 = vld [vmem:[%s1022_s15 + $0x24] sm:$0xf0]  ;;  %v799_v2 = vld [vmem:[%s1022_s15 + $0x24] sm:$0xf] }
  0x35   : > { %v382_v21 = vmul.f32 128.0, %v860_v20  ;;  %vm386_vm0 = vweird.f32 %v860_v20  ;;  %554 = vmatpush.bf16.msra.mxu1 %v780_v45  ;;  %v744_v3 = vor.u32 %v800_v1, %v743_v0  ;;  %v745_v4 = vld [vmem:[%s1022_s15 + $0x28] sm:$0xf0]  ;;  %v735_v6 = vld [vmem:[%s1022_s15 + $0x10] sm:$0xf]  ;;  %s1107_s26 = smov (!%p367_p11, %s724_s26), 3 }
  0x36   : > { %v748_v5 = vor.u32 %v799_v2, %v745_v4  ;;  %v798_v7 = vld [vmem:[%s1022_s15 + $0x14] sm:$0xf0]  ;;  %v797_v8 = vld [vmem:[%s1022_s15 + $0x14] sm:$0xf]  ;;  %v737_v10 = vld [vmem:[%s1022_s15 + $0x18] sm:$0xf0]  ;;  %s369_s6 = scalar_lea.vmem %s1097_s4, %s1107_s26 }
  0x37   : > { %v383_v22 = vsub.f32 1.0, %v382_v21  ;;  %v736_v9 = vor.u32 %v798_v7, %v735_v6  ;;  %v727_v11 = vld [vmem:[%s1022_s15] sm:$0xf]  ;;  %v796_v12 = vld [vmem:[%s1022_s15 + $0x4] sm:$0xf0]  ;;  %v740_v13 = vor.u32 %v797_v8, %v737_v10  ;;  %s811_s9 = sshll.u32 (%p971_p6), %s895_s20, 3 }
  0x38   : > { %379 = vadd.xlane.f32.xlu0 %v815_v18  ;;  %541 = vmatpush.bf16.msra.mxu0 %v768_v49  ;;  %v795_v14 = vld [vmem:[%s1022_s15 + $0x4] sm:$0xf]  ;;  %v729_v15 = vld [vmem:[%s1022_s15 + $0x8] sm:$0xf0]  ;;  %v728_v16 = vor.u32 %v796_v12, %v727_v11  ;;  %v857_v36 = vld [vmem:[%s1094_s1] ss:$0 sm:$0xff]  ;;  %s583_s11 = scalar_lea.vmem (%p971_p6), %s1098_s5, %s811_s9 }
  0x39   : > { %v384_v23 = vmul.f32 %v860_v20, %v383_v22  ;;  %555 = vmatpush.bf16.msra.mxu1 %v772_v51  ;;  %v858_v43 = vld [vmem:[%s1095_s2] ss:$0 sm:$0xff] }
  0x3b   : > { %v385_v24 = vadd.f32 %v860_v20, %v384_v23 }
  0x3c   : > { %542 = vmatpush.bf16.msra.mxu0 %v760_v55 }
  0x3d   : > { %v1007_v25 = vsel %vm386_vm0, %v860_v20, %v385_v24  ;;  %556 = vmatpush.bf16.msra.mxu1 %v764_v57 }
  0x40   : > { %543 = vmatpush.bf16.msra.mxu0 %v752_v61 }
  0x41   : > { %557 = vmatpush.bf16.msra.mxu1 %v756_v63 }
  0x44   : > { %544 = vmatpush.bf16.msra.mxu0 %v744_v3 }
  0x45   : > { %558 = vmatpush.bf16.msra.mxu1 %v748_v5 }
  0x48   : > { %545 = vmatpush.bf16.msra.mxu0 %v736_v9 }
  0x49   : > { %559 = vmatpush.bf16.msra.mxu1 %v740_v13 }
  0x4c   : > { %546 = vmatpush.bf16.msra.mxu0 %v728_v16 }
  0xa3   : > { %v378_v26 = vpop.xlane.xlu0 %377 }
  0xa4   : > { %v388_v27 = vmul.f32 %v1007_v25, %v378_v26 }
  0xa6   : > { %v1010_v28 = vsub.f32 %v814_v17, %v388_v27  ;;  %v732_v17 = vor.u32 %v795_v14, %v729_v15 }
  0xa8   : > { %v392_v29 = vmul.f32 %v1010_v28, %v1010_v28  ;;  %560 = vmatpush.bf16.msra.mxu1 %v732_v17  ;;  %v404_v39 = vmul.f32 %v857_v36, %v1010_v28  ;;  %v453_v28 = vld [vmem:[%s369_s6] sm:$0x3] }
  0xa9   : > { %v456_v49 = vperm.slane %v453_v28, 1 }
  0xaa   : > { %394 = vadd.xlane.f32.xlu1 %v392_v29 }
  0xab   : > { %v380_v30 = vpop.xlane.xlu0 %379 }
  0xac   : > { %v389_v31 = vmul.f32 %v1007_v25, %v380_v30 }
  0xae   : > { %v1015_v32 = vsub.f32 %v815_v18, %v389_v31 }
  0xb0   : > { %v393_v33 = vmul.f32 %v1015_v32, %v1015_v32  ;;  %v405_v41 = vmul.f32 %v857_v36, %v1015_v32  ;;  %v455_v32 = vperm.slane %v453_v28, 0 }
  0xb2   : > { %396 = vadd.xlane.f32.xlu1 %v393_v33 }
 0x11d   : > { %v395_v18 = vpop.xlane.xlu1 %394 }
 0x11e   : > { %v398_v19 = vmul.f32 %v395_v18, %v1007_v25 }
 0x120   : > { %v406_v20 = vadd.f32 1e-06, %v398_v19 }
 0x122   : > { %861 = vrsqrt.f32 %v406_v20  ;;  %vm414_vm2 = vweird.f32 %v406_v20 }
 0x125   : > { %v397_v21 = vpop.xlane.xlu1 %396 }
 0x126   : > { %v399_v22 = vmul.f32 %v397_v21, %v1007_v25 }
 0x128   : > { %v862_v23 = vpop.eup %861  ;;  %v407_v24 = vadd.f32 1e-06, %v399_v22 }
 0x129   : > { %v409_v26 = vmul.f32 %v862_v23, %v406_v20  ;;  %vm415_vm1 = vweird.f32 %v862_v23 }
 0x12a   : > { %863 = vrsqrt.f32 %v407_v24  ;;  %vm416_vm3 = vmor %vm414_vm2, %vm415_vm1  ;;  %vm424_vm5 = vweird.f32 %v407_v24 }
 0x12b   : > { %v410_v27 = vmul.f32 %v862_v23, %v409_v26 }
 0x12d   : > { %v411_v29 = vmul.f32 0.5, %v410_v27 }
 0x12f   : > { %v412_v30 = vsub.f32 1.5, %v411_v29 }
 0x130   : > { %v864_v31 = vpop.eup %863 }
 0x131   : > { %v419_v33 = vmul.f32 %v864_v31, %v407_v24  ;;  %v413_v34 = vmul.f32 %v862_v23, %v412_v30  ;;  %vm425_vm4 = vweird.f32 %v864_v31 }
 0x132   : > { %vm426_vm6 = vmor %vm424_vm5, %vm425_vm4 }
 0x133   : > { %v420_v35 = vmul.f32 %v864_v31, %v419_v33  ;;  %v417_v38 = vsel %vm416_vm3, %v862_v23, %v413_v34 }
 0x134   : > { %v428_v42 = vmul.f32 %v417_v38, %v404_v39 }
 0x135   : > { %v421_v37 = vmul.f32 0.5, %v420_v35 }
 0x136   : > { %v434_v46 = vadd.f32 %v858_v43, %v428_v42 }
 0x137   : > { %v422_v25 = vsub.f32 1.5, %v421_v37 }
 0x139   : > { %v423_v40 = vmul.f32 %v864_v31, %v422_v25 }
 0x13b   : > { %v427_v44 = vsel %vm426_vm6, %v864_v31, %v423_v40 }
 0x13c   : > { %v429_v45 = vmul.f32 %v427_v44, %v405_v41 }
 0x13e   : > { %v435_v47 = vadd.f32 %v858_v43, %v429_v45 }
 0x140   : > { %v436_v48 = vpack.c.bf16 %v435_v47, %v434_v46 }
 0x142   : > { %547 = vmatmul.bf16.vlgmr.msra.gmra.mxu0 %v436_v48  ;;  %561 = vmatmul.bf16.vlgmr.msra.gmra.mxu1 %v436_v48 }
 0x1bf   : > { %v548_v50 = vpop.f32.mrf.mxu0  ;;  %v562_v51 = vpop.f32.mrf.mxu1 }
 0x1c0   : > { %v549_v52 = vadd.f32 %v548_v50, %v455_v32  ;;  %v563_v53 = vadd.f32 %v562_v51, %v456_v49 }
 0x1c2   : > { %v567_v54 = vpack.c.bf16 %v563_v53, %v549_v52 }
 0x1c4   : > { %569 = vst [vmem:[%s358_s8] sm:$0xff] %v567_v54 }
 0x1c7   : > { %v550_v55 = vpop.f32.mrf.mxu0  ;;  %v564_v56 = vpop.f32.mrf.mxu1 }
 0x1c8   : > { %v551_v57 = vadd.f32 %v550_v55, %v455_v32  ;;  %v565_v58 = vadd.f32 %v564_v56, %v456_v49  ;;  %577 = sbr.rel (!%p971_p6) target bundleno = 469 (0x1d5), region = 82 }
 0x1ca   : > { %v568_v59 = vpack.c.bf16 %v565_v58, %v551_v57 }
 0x1cb   : > { %v614_v60 = vld [vmem:[%s358_s8] sm:$0xff] (%p971_p6) }
 0x1cc   : > { %570 = vst [vmem:[%s358_s8 + $0x8] sm:$0xff] %v568_v59 }
 0x1cd   : > { %615 = vst [vmem:[%s583_s11] sm:$0xff] %v614_v60 }
 0x1d3   : > { %v616_v61 = vld [vmem:[%s358_s8 + $0x8] sm:$0xff] }
 0x1d4   : > { %617 = vst [vmem:[%s583_s11 + $0x10] sm:$0xff] %v616_v61 }
 0x1d5 PF: > { %s15_s22 = sadd.s32 1, %s903_s22   ;;  %s1100_s18 = smov %s891_s19 }
 0x1d6   : > { %p12_p12 = scmp.ge.s32.totalorder %s15_s22, 4   ;;  %s1101_s19 = smov %s976_s28 }
 0x1d7   : > { %s1102_s20 = smov %s899_s21  ;;  %s1103_s21 = smov %s1105_s23 }
 0x1d8   :  { %14 = sbr.rel (!%p12_p12) target bundleno = 3 (0x3), region = 157 }

// kernel: bert_lm_lss_forward.12
= control target key start
LH: loop header
LB: loop body
LE: loop exit
PB: predicated region body
PF: predicated region fallthrough
CT: control target
= control target key end

     0   :  { %s812_s15 = smov 0   ;;  %s814_s16 = smov 0   ;;  %s893_s0 = inlined_call_operand.vmem [shape: bf16[2,8,384], index: 0, kind: input, shape index: {}, may-alias: {0,1,2}]   ;;  %s894_s1 = inlined_call_operand.vmem [shape: bf16[2,8,384], index: 1, kind: input, shape index: {}, may-alias: {0,1,2}]   ;;  %s895_s2 = inlined_call_operand.vmem [shape: bf16[2,8,384], index: 2, kind: input, shape index: {}, may-alias: {0,1,2}]   ;;  %s896_s3 = inlined_call_operand.vmem [shape: f32[2,1,8], index: 3, kind: input, shape index: {}]   ;;  %s897_s4 = inlined_call_operand.vmem [shape: bf16[2,8,128], index: 4, kind: output, shape index: {}]  }
   0x1   :  { %s816_s17 = smov 0  }
   0x2 LB: > { %s33_s18 = sadd.s32 1, %s777_s16  ;;  %p700_p0 = scmp.ge.s32.totalorder %s781_s17, 1  ;;  %s781_s17 = sphi %s816_s17, %s14_s17   ;;  %s777_s16 = sphi %s814_s16, %s899_s16   ;;  %s773_s15 = sphi %s812_s15, %s898_s15  }
   0x3   : > { %p35_p1 = scmp.ge.s32.totalorder %s33_s18, 2  ;;  %p236_p2 = scmp.lt.s32.totalorder %s781_s17, 3 }
   0x5   : > { %s901_s18 = smov (%p35_p1, %s33_s18), 0  ;;  %p237_p3 = pnand %p700_p0, %p236_p2 }
   0x6   : > { %p294_p4 = scmp.lt.s32.totalorder (!%p237_p3), %s773_s15, 1  ;;  %s783_s29 = smov (!%p237_p3), 64  }
   0x7   : > { %240 = sbr.rel (%p237_p3) target bundleno = 894 (0x37e), region = 36 }
   0xc   : > { %s903_s15 = smov (!%p294_p4, %s773_s15), 1  ;;  %vm346_vm0 = vcmask 523264   ;;  %vm341_vm1 = vcmask 7168   ;;  %v784_v9 = vmov -inf   ;;  %vm377_vm2 = vcmask 64512  }
   0xd   : > { %s833_s19 = smul.u32 12, %s903_s15  ;;  %s328_s28 = scalar_lea.vmem %s896_s3, %s903_s15  ;;  %342 = vst.msk [vmem:[#allocation2] sm:$0xff] %vm341_vm1, %v784_v9  ;;  %v785_v18 = vmov 0   ;;  %vm412_vm3 = vcmask 1043456   ;;  %v786_v32 = vmov 0.0  }
   0xe   : > { %343 = vst.msk [vmem:[#allocation2 + $0x8] sm:$0xff] %vm341_vm1, %v784_v9  ;;  %v746_v13 = vld [vmem:[%s328_s28] ss:$0 sm:$0xff]  ;;  %745 = vset.pattern.permute.xlu0 %v785_v18  ;;  %744 = vset.pattern.permute.xlu1 %v785_v18  ;;  %s704_s7 = sshll.u32 %s903_s15, 2 }
   0xf   : > { %s628_s22 = scalar_lea.vmem %s894_s1, %s833_s19  ;;  %s302_s25 = scalar_lea.vmem %s893_s0, %s833_s19  ;;  %344 = vst.msk [vmem:[#allocation3] sm:$0xff] %vm341_vm1, %v786_v32 }
  0x10   : > { %v705_v0 = vld [vmem:[%s628_s22 + $0x4] sm:$0xf]  ;;  %v432_v4 = vld [vmem:[%s302_s25] sm:$0xf]  ;;  %s634_s6 = scalar_lea.vmem %s895_s2, %s833_s19  ;;  %348 = vst.msk [vmem:[#allocation4 + $0x8] sm:$0xff] %vm346_vm0, %v786_v32  ;;  %s335_s10 = scalar_lea.vmem %s897_s4, %s704_s7 }
  0x11   : > { %v709_v1 = vld [vmem:[%s628_s22 + $0x4] sm:$0xf]  ;;  %v361_v2 = vsel %vm346_vm0, %v705_v0, 0  ;;  %v436_v6 = vunpack.c.l.b16 %v432_v4  ;;  %v350_v7 = vld [vmem:[%s302_s25] sm:$0xf]  ;;  %345 = vst.msk [vmem:[#allocation3 + $0x8] sm:$0xff] %vm341_vm1, %v786_v32 }
  0x12   : > { %v441_v3 = vunpack.c.l.b16 %v709_v1  ;;  %370 = vmatpush.bf16.xpose.msra.mxu0 %v361_v2  ;;  %v710_v19 = vld [vmem:[%s634_s6 + $0x8] sm:$0xf]  ;;  %347 = vst.msk [vmem:[#allocation4] sm:$0xff] %vm346_vm0, %v786_v32 }
  0x13   : > { %v437_v8 = vpack.c.b16 %v436_v6, %v436_v6  ;;  %v499_v20 = vunpack.c.l.b16 %v710_v19  ;;  %v706_v30 = vld [vmem:[%s634_s6 + $0x8] sm:$0xf] }
  0x14   : > { %v442_v5 = vpack.c.b16 %v441_v3, %v441_v3  ;;  %v376_v22 = vld [vmem:[#allocation2] sm:$0xff]  ;;  %v414_v31 = vsel %vm412_vm3, %v706_v30, 0 }
  0x15   : > { %v500_v21 = vpack.c.b16 %v499_v20, %v499_v20  ;;  %423 = vmatpush.bf16.msra.mxu1 %v414_v31  ;;  %v465_v36 = vld [vmem:[#allocation2 + $0x8] sm:$0xff] }
  0x16   : > { %443 = vrot.lane.b32.xlu0 %v442_v5, %s783_s29  ;;  %v393_v49 = vld [vmem:[#allocation3] sm:$0xff] }
  0x17   : > { %v490_v2 = vld [vmem:[#allocation4 + $0x8] sm:$0xff] }
  0x18   : > { %v482_v61 = vld [vmem:[#allocation3 + $0x8] sm:$0xff] }
  0x19   : > { %707 = vmatmul.msk.bf16.vlgmr.msra.gmra.mxu0 %vm346_vm0, %v350_v7 }
  0x1e   : > { %438 = vrot.lane.b32.xlu0 %v437_v8, %s783_s29 }
  0x88   : > { %v444_v10 = vpop.permute.xlu0 %443 }
  0x89   : > { %v449_v11 = vsel %vm346_vm0, %v444_v10, 0 }
  0x8a   : > { %458 = vmatpush.bf16.xpose.msra.mxu2 %v449_v11 }
  0x90   : > { %v439_v12 = vpop.permute.xlu0 %438 }
  0x91   : > { %711 = vmatmul.msk.bf16.vlgmr.msra.gmra.mxu2 %vm346_vm0, %v439_v12 }
  0x96   : > { %v372_v14 = vpop.f32.mrf.mxu0 }
  0x97   : > { %v373_v15 = vadd.f32 %v746_v13, %v372_v14  ;;  %v401_v14 = vld [vmem:[#allocation4] sm:$0xff] }
  0x99   : > { %v378_v16 = vsel %vm377_vm2, %v373_v15, -inf }
  0x9a   : > { %379 = vmax.xlane.f32.xlu2 %v378_v16 }
  0x9e   : > { %v374_v17 = vpop.f32.mrf.mxu0 }
  0xb2   : > { %501 = vrot.lane.b32.xlu2 %v500_v21, %s783_s29 }
 0x10d   : > { %v380_v23 = vpop.xlane.xlu2 %379 }
 0x10e   : > { %v381_v24 = vmax.f32 %v376_v22, %v380_v23 }
 0x110   : > { %v382_v25 = vsub.f32 %v376_v22, %v381_v24  ;;  %431 = vst.msk [vmem:[#allocation2] sm:$0xff] %vm341_vm1, %v381_v24  ;;  %387 = vperm.xlu0 %745, %v381_v24  }
 0x112   : > { %v383_v47 = vmul.f32 1.442695, %v382_v25 }
 0x114   : > { %v460_v26 = vpop.f32.mrf.mxu2 }
 0x115   : > { %v461_v27 = vadd.f32 %v746_v13, %v460_v26  ;;  %v502_v45 = vpop.permute.xlu2 %501 }
 0x116   : > { %v507_v46 = vsel %vm412_vm3, %v502_v45, 0 }
 0x117   : > { %v466_v28 = vsel %vm377_vm2, %v461_v27, -inf  ;;  %516 = vmatpush.bf16.msra.mxu3 %v507_v46 }
 0x118   : > { %467 = vmax.xlane.f32.xlu1 %v466_v28 }
 0x11c   : > { %v462_v29 = vpop.f32.mrf.mxu2 }
 0x182   : > { %v388_v33 = vpop.permute.xlu0 %387 }
 0x183   : > { %v390_v34 = vsub.f32 %v373_v15, %v388_v33 }
 0x185   : > { %v391_v35 = vmul.f32 1.442695, %v390_v34 }
 0x187   : > { %747 = vpow2.f32 %v391_v35 }
 0x18b   : > { %v468_v37 = vpop.xlane.xlu1 %467 }
 0x18c   : > { %v469_v38 = vmax.f32 %v465_v36, %v468_v37 }
 0x18d   : > { %v748_v39 = vpop.eup %747 }
 0x18e   : > { %v470_v40 = vsub.f32 %v465_v36, %v469_v38  ;;  %524 = vst.msk [vmem:[#allocation2 + $0x8] sm:$0xff] %vm341_vm1, %v469_v38  ;;  %475 = vperm.xlu1 %744, %v469_v38   ;;  %v395_v41 = vsel %vm377_vm2, %v748_v39, 0.0  ;;  %v408_v42 = vpack.c.bf16 %v748_v39, %v748_v39 }
 0x18f   : > { %396 = vadd.xlane.f32.xlu2 %v395_v41 }
 0x190   : > { %v471_v43 = vmul.f32 1.442695, %v470_v40  ;;  %708 = vmatmul.msk.bf16.vlgmr.msra.gmra.mxu1 %vm377_vm2, %v408_v42 }
 0x192   : > { %749 = vpow2.f32 %v471_v43 }
 0x193   : > { %751 = vpow2.f32 %v383_v47 }
 0x198   : > { %v750_v44 = vpop.eup %749 }
 0x199   : > { %493 = vperm.xlu1 %744, %v750_v44   ;;  %v752_v48 = vpop.eup %751  ;;  %v483_v62 = vmul.f32 %v750_v44, %v482_v61 }
 0x19a   : > { %v394_v52 = vmul.f32 %v752_v48, %v393_v49 }
 0x200   : > { %v476_v50 = vpop.permute.xlu1 %475 }
 0x201   : > { %v478_v51 = vsub.f32 %v461_v27, %v476_v50 }
 0x202   : > { %v397_v54 = vpop.xlane.xlu2 %396 }
 0x203   : > { %v479_v53 = vmul.f32 1.442695, %v478_v51  ;;  %v398_v55 = vadd.f32 %v397_v54, %v394_v52 }
 0x205   : > { %753 = vpow2.f32 %v479_v53  ;;  %400 = vst.msk [vmem:[#allocation3] sm:$0xff] %vm341_vm1, %v398_v55 }
 0x20b   : > { %v754_v56 = vpop.eup %753  ;;  %v494_v3 = vpop.permute.xlu1 %493 }
 0x20c   : > { %v484_v57 = vsel %vm377_vm2, %v754_v56, 0.0  ;;  %v497_v58 = vpack.c.bf16 %v754_v56, %v754_v56  ;;  %v496_v4 = vmul.f32 %v494_v3, %v490_v2  ;;  %v529_v8 = vld [vmem:[#allocation3] sm:$0xff] }
 0x20d   : > { %485 = vadd.xlane.f32.xlu0 %v484_v57  ;;  %v425_v59 = vpop.f32.mrf.mxu1 }
 0x20e   : > { %712 = vmatmul.msk.bf16.vlgmr.msra.gmra.mxu3 %vm377_vm2, %v497_v58 }
 0x215   : > { %v427_v60 = vpop.f32.mrf.mxu1 }
 0x280   : > { %v486_v63 = vpop.xlane.xlu0 %485 }
 0x281   : > { %v487_v0 = vadd.f32 %v486_v63, %v483_v62 }
 0x283   : > { %488 = vst.msk [vmem:[#allocation3 + $0x8] sm:$0xff] %vm341_vm1, %v487_v0 }
 0x28a   : > { %v538_v1 = vld [vmem:[#allocation3 + $0x8] sm:$0xff] }
 0x28b   : > { %755 = vrcp.f32 %v538_v1 }
 0x28c   : > { %757 = vrcp.f32 %v529_v8 }
 0x291   : > { %v756_v5 = vpop.eup %755  ;;  %v518_v6 = vpop.f32.mrf.mxu3 }
 0x292   : > { %v522_v7 = vadd.f32 %v518_v6, %v496_v4  ;;  %542 = vperm.xlu1 %744, %v756_v5   ;;  %v758_v10 = vpop.eup %757 }
 0x294   : > { %523 = vst.msk [vmem:[#allocation4 + $0x8] sm:$0xff] %vm346_vm0, %v522_v7 }
 0x299   : > { %v520_v9 = vpop.f32.mrf.mxu3 }
 0x29a   : > { %404 = vperm.xlu1 %744, %v752_v48  }
 0x29b   : > { %v537_v12 = vld [vmem:[#allocation4 + $0x8] sm:$0xff] }
 0x2a2   : > { %533 = vperm.xlu1 %744, %v758_v10  }
 0x304   : > { %v543_v11 = vpop.permute.xlu1 %542 }
 0x305   : > { %v545_v13 = vmul.f32 %v543_v11, %v537_v12 }
 0x307   : > { %547 = vrot.lane.b32.xlu1 %v545_v13, %s783_s29 }
 0x30c   : > { %v405_v15 = vpop.permute.xlu1 %404 }
 0x30d   : > { %v407_v16 = vmul.f32 %v405_v15, %v401_v14 }
 0x30f   : > { %v429_v17 = vadd.f32 %v425_v59, %v407_v16 }
 0x311   : > { %430 = vst.msk [vmem:[#allocation4] sm:$0xff] %vm346_vm0, %v429_v17 }
 0x314   : > { %v534_v18 = vpop.permute.xlu1 %533 }
 0x318   : > { %v528_v19 = vld [vmem:[#allocation4] sm:$0xff] }
 0x319   : > { %v536_v20 = vmul.f32 %v534_v18, %v528_v19 }
 0x379   : > { %v548_v21 = vpop.permute.xlu1 %547 }
 0x37a   : > { %v550_v22 = vsel %vm346_vm0, %v536_v20, %v548_v21 }
 0x37b   : > { %v551_v23 = vpack.c.bf16 %v550_v22, %v550_v22 }
 0x37d   : > { %552 = vst [vmem:[%s335_s10] sm:$0xf] %v551_v23 }
 0x37e PF: > { %s14_s17 = sadd.s32 1, %s781_s17   ;;  %s898_s15 = smov %s777_s16 }
 0x37f   : > { %p11_p5 = scmp.ge.s32.totalorder %s14_s17, 4   ;;  %s899_s16 = smov %s901_s18 }
 0x381   :  { %13 = sbr.rel (!%p11_p5) target bundleno = 2 (0x2), region = 86 }

// kernel: bert_lm_lss_forward.15
= control target key start
LH: loop header
LB: loop body
LE: loop exit
PB: predicated region body
PF: predicated region fallthrough
CT: control target
= control target key end

     0   :  { %s416_s1 = inlined_call_operand.vmem [shape: bf16[256,128], index: 1, kind: input, shape index: {}]   ;;  %s417_s0 = inlined_call_operand.vmem [shape: bf16[16,256], index: 0, kind: input, shape index: {}]   ;;  %s418_s2 = inlined_call_operand.vmem [shape: f32[1,128], index: 2, kind: input, shape index: {}]   ;;  %s419_s3 = inlined_call_operand.vmem [shape: bf16[16,128], index: 3, kind: input, shape index: {}]   ;;  %s420_s4 = inlined_call_operand.vmem [shape: bf16[16,128], index: 4, kind: output, shape index: {}]  }
   0x1   :  { %v303_v0 = vld [vmem:[%s416_s1 + $0x38] sm:$0xff]  ;;  %v302_v2 = vld [vmem:[%s416_s1 + $0x30] sm:$0xff]  ;;  %v301_v4 = vld [vmem:[%s416_s1 + $0x28] sm:$0xff] }
   0x2   :  { %v311_v1 = vld [vmem:[%s416_s1 + $0x78] sm:$0xff]  ;;  %165 = vmatpush.bf16.msra.mxu0 %v303_v0  ;;  %v310_v3 = vld [vmem:[%s416_s1 + $0x70] sm:$0xff]  ;;  %v309_v5 = vld [vmem:[%s416_s1 + $0x68] sm:$0xff] }
   0x3   :  { %179 = vmatpush.bf16.msra.mxu1 %v311_v1  ;;  %v300_v6 = vld [vmem:[%s416_s1 + $0x20] sm:$0xff]  ;;  %v299_v8 = vld [vmem:[%s416_s1 + $0x18] sm:$0xff]  ;;  %v298_v10 = vld [vmem:[%s416_s1 + $0x10] sm:$0xff] }
   0x4   :  { %v308_v7 = vld [vmem:[%s416_s1 + $0x60] sm:$0xff]  ;;  %v307_v9 = vld [vmem:[%s416_s1 + $0x58] sm:$0xff]  ;;  %v306_v11 = vld [vmem:[%s416_s1 + $0x50] sm:$0xff] }
   0x5   :  { %v297_v12 = vld [vmem:[%s416_s1 + $0x8] sm:$0xff]  ;;  %v296_v14 = vld [vmem:[%s416_s1] sm:$0xff] }
   0x6   :  { %166 = vmatpush.bf16.msra.mxu0 %v302_v2  ;;  %v305_v13 = vld [vmem:[%s416_s1 + $0x48] sm:$0xff]  ;;  %v304_v15 = vld [vmem:[%s416_s1 + $0x40] sm:$0xff] }
   0x7   :  { %180 = vmatpush.bf16.msra.mxu1 %v310_v3  ;;  %v224_v16 = vld [vmem:[%s417_s0] sm:$0xf]  ;;  %v295_v17 = vld [vmem:[%s417_s0 + $0x4] sm:$0xf0]  ;;  %v294_v18 = vld [vmem:[%s417_s0 + $0x4] sm:$0xf] }
   0x8   :  { %v226_v19 = vld [vmem:[%s417_s0 + $0x8] sm:$0xf0]  ;;  %v225_v20 = vor.u32 %v295_v17, %v224_v16  ;;  %v321_v25 = vld [vmem:[%s418_s2] ss:$0 sm:$0xff] }
   0x9   :  { %v229_v21 = vor.u32 %v294_v18, %v226_v19  ;;  %v313_v26 = vld [vmem:[%s419_s3] sm:$0xff]  }
   0xa   :  { %167 = vmatpush.bf16.msra.mxu0 %v301_v4  ;;  %v314_v30 = vunpack.c.l.bf16 %v313_v26  ;;  %v315_v32 = vunpack.c.h.bf16 %v313_v26 }
   0xb   :  { %181 = vmatpush.bf16.msra.mxu1 %v309_v5 }
   0xe   :  { %168 = vmatpush.bf16.msra.mxu0 %v300_v6 }
   0xf   :  { %182 = vmatpush.bf16.msra.mxu1 %v308_v7 }
  0x12   :  { %169 = vmatpush.bf16.msra.mxu0 %v299_v8 }
  0x13   :  { %183 = vmatpush.bf16.msra.mxu1 %v307_v9 }
  0x16   :  { %170 = vmatpush.bf16.msra.mxu0 %v298_v10 }
  0x17   :  { %184 = vmatpush.bf16.msra.mxu1 %v306_v11 }
  0x1a   :  { %171 = vmatpush.bf16.msra.mxu0 %v297_v12 }
  0x1b   :  { %185 = vmatpush.bf16.msra.mxu1 %v305_v13 }
  0x1e   :  { %172 = vmatpush.bf16.msra.mxu0 %v296_v14 }
  0x1f   :  { %186 = vmatpush.bf16.msra.mxu1 %v304_v15 }
  0x21   :  { %173 = vmatmul.bf16.vlgmr.msra.gmra.mxu0 %v225_v20 }
  0x22   :  { %187 = vmatmul.bf16.vlgmr.msra.gmra.mxu1 %v229_v21 }
  0x9e   :  { %v174_v22 = vpop.f32.mrf.mxu0 }
  0x9f   :  { %v188_v23 = vpop.f32.mrf.mxu1 }
  0xa0   :  { %v189_v24 = vadd.f32 %v188_v23, %v174_v22 }
  0xa2   :  { %v206_v29 = vadd.f32 %v321_v25, %v189_v24 }
  0xa4   :  { %v212_v34 = vadd.f32 %v314_v30, %v206_v29 }
  0xa6   :  { %v176_v27 = vpop.f32.mrf.mxu0 }
  0xa7   :  { %v190_v28 = vpop.f32.mrf.mxu1 }
  0xa8   :  { %v191_v31 = vadd.f32 %v190_v28, %v176_v27 }
  0xaa   :  { %v207_v33 = vadd.f32 %v321_v25, %v191_v31 }
  0xac   :  { %v213_v35 = vadd.f32 %v315_v32, %v207_v33 }
  0xae   :  { %v319_v36 = vpack.c.bf16 %v213_v35, %v212_v34 }
  0xb0   :  { %320 = vst [vmem:[%s420_s4] sm:$0xff] %v319_v36  }

// kernel: bert_lm_lss_forward.21
= control target key start
LH: loop header
LB: loop body
LE: loop exit
PB: predicated region body
PF: predicated region fallthrough
CT: control target
= control target key end

     0   :  { %vm18_vm0 = vcmask 7168   ;;  %s743_s1 = inlined_call_operand.vmem [shape: bf16[128,384], index: 1, kind: input, shape index: {}]   ;;  %s744_s0 = inlined_call_operand.vmem [shape: bf16[16,128], index: 0, kind: input, shape index: {}]   ;;  %s745_s2 = inlined_call_operand.vmem [shape: f32[1,384], index: 2, kind: input, shape index: {}]   ;;  %s746_s3 = inlined_call_operand.vmem [shape: f32[16,384], index: 3, kind: output, shape index: {}]  }
   0x1   :  { %v454_v0 = vld [vmem:[%s743_s1 + $0xa8] sm:$0xf]  ;;  %v487_v1 = vld [vmem:[%s743_s1 + $0xb0] sm:$0xf0]  ;;  %v486_v2 = vld [vmem:[%s743_s1 + $0xac] sm:$0xf] }
   0x2   :  { %v455_v3 = vor.u32 %v487_v1, %v454_v0  ;;  %v456_v4 = vld [vmem:[%s743_s1 + $0xb4] sm:$0xf0]  ;;  %v462_v5 = vld [vmem:[%s743_s1 + $0xb0] sm:$0xf]  ;;  %v488_v6 = vld [vmem:[%s743_s1 + $0xb8] sm:$0xf0] }
   0x3   :  { %v459_v7 = vor.u32 %v486_v2, %v456_v4  ;;  %v463_v8 = vor.u32 %v488_v6, %v462_v5  ;;  %v442_v9 = vld [vmem:[%s743_s1 + $0x90] sm:$0xf]  ;;  %v484_v10 = vld [vmem:[%s743_s1 + $0x98] sm:$0xf0]  ;;  %v483_v11 = vld [vmem:[%s743_s1 + $0x94] sm:$0xf] }
   0x4   :  { %199 = vmatpush.bf16.msra.mxu0 %v455_v3  ;;  %v443_v12 = vor.u32 %v484_v10, %v442_v9  ;;  %v444_v13 = vld [vmem:[%s743_s1 + $0x9c] sm:$0xf0]  ;;  %v450_v14 = vld [vmem:[%s743_s1 + $0x98] sm:$0xf]  ;;  %v485_v15 = vld [vmem:[%s743_s1 + $0xa0] sm:$0xf0] }
   0x5   :  { %213 = vmatpush.bf16.msra.mxu1 %v459_v7  ;;  %227 = vmatpush.bf16.msra.mxu2 %v463_v8  ;;  %v447_v16 = vor.u32 %v483_v11, %v444_v13  ;;  %v451_v17 = vor.u32 %v485_v15, %v450_v14  ;;  %v430_v18 = vld [vmem:[%s743_s1 + $0x78] sm:$0xf]  ;;  %v481_v19 = vld [vmem:[%s743_s1 + $0x80] sm:$0xf0]  ;;  %v480_v20 = vld [vmem:[%s743_s1 + $0x7c] sm:$0xf] }
   0x6   :  { %v432_v21 = vld [vmem:[%s743_s1 + $0x84] sm:$0xf0]  ;;  %v438_v22 = vld [vmem:[%s743_s1 + $0x80] sm:$0xf]  ;;  %v482_v23 = vld [vmem:[%s743_s1 + $0x88] sm:$0xf0]  ;;  %v431_v24 = vor.u32 %v481_v19, %v430_v18 }
   0x7   :  { %v435_v25 = vor.u32 %v480_v20, %v432_v21  ;;  %v439_v26 = vor.u32 %v482_v23, %v438_v22  ;;  %v418_v27 = vld [vmem:[%s743_s1 + $0x60] sm:$0xf]  ;;  %v478_v28 = vld [vmem:[%s743_s1 + $0x68] sm:$0xf0]  ;;  %v477_v29 = vld [vmem:[%s743_s1 + $0x64] sm:$0xf] }
   0x8   :  { %200 = vmatpush.bf16.msra.mxu0 %v443_v12  ;;  %v420_v30 = vld [vmem:[%s743_s1 + $0x6c] sm:$0xf0]  ;;  %v426_v31 = vld [vmem:[%s743_s1 + $0x68] sm:$0xf]  ;;  %v479_v32 = vld [vmem:[%s743_s1 + $0x70] sm:$0xf0]  ;;  %v419_v33 = vor.u32 %v478_v28, %v418_v27 }
   0x9   :  { %214 = vmatpush.bf16.msra.mxu1 %v447_v16  ;;  %228 = vmatpush.bf16.msra.mxu2 %v451_v17  ;;  %v423_v34 = vor.u32 %v477_v29, %v420_v30  ;;  %v427_v35 = vor.u32 %v479_v32, %v426_v31  ;;  %v406_v36 = vld [vmem:[%s743_s1 + $0x48] sm:$0xf]  ;;  %v475_v37 = vld [vmem:[%s743_s1 + $0x50] sm:$0xf0]  ;;  %v474_v38 = vld [vmem:[%s743_s1 + $0x4c] sm:$0xf] }
   0xa   :  { %v408_v39 = vld [vmem:[%s743_s1 + $0x54] sm:$0xf0]  ;;  %v414_v40 = vld [vmem:[%s743_s1 + $0x50] sm:$0xf]  ;;  %v476_v41 = vld [vmem:[%s743_s1 + $0x58] sm:$0xf0]  ;;  %v407_v42 = vor.u32 %v475_v37, %v406_v36 }
   0xb   :  { %v411_v43 = vor.u32 %v474_v38, %v408_v39  ;;  %v415_v44 = vor.u32 %v476_v41, %v414_v40  ;;  %v394_v45 = vld [vmem:[%s743_s1 + $0x30] sm:$0xf]  ;;  %v472_v46 = vld [vmem:[%s743_s1 + $0x38] sm:$0xf0]  ;;  %v471_v47 = vld [vmem:[%s743_s1 + $0x34] sm:$0xf] }
   0xc   :  { %201 = vmatpush.bf16.msra.mxu0 %v431_v24  ;;  %v396_v48 = vld [vmem:[%s743_s1 + $0x3c] sm:$0xf0]  ;;  %v402_v49 = vld [vmem:[%s743_s1 + $0x38] sm:$0xf]  ;;  %v473_v50 = vld [vmem:[%s743_s1 + $0x40] sm:$0xf0]  ;;  %v395_v51 = vor.u32 %v472_v46, %v394_v45 }
   0xd   :  { %215 = vmatpush.bf16.msra.mxu1 %v435_v25  ;;  %229 = vmatpush.bf16.msra.mxu2 %v439_v26  ;;  %v399_v52 = vor.u32 %v471_v47, %v396_v48  ;;  %v403_v53 = vor.u32 %v473_v50, %v402_v49  ;;  %v382_v54 = vld [vmem:[%s743_s1 + $0x18] sm:$0xf]  ;;  %v469_v55 = vld [vmem:[%s743_s1 + $0x20] sm:$0xf0]  ;;  %v468_v56 = vld [vmem:[%s743_s1 + $0x1c] sm:$0xf] }
   0xe   :  { %v384_v57 = vld [vmem:[%s743_s1 + $0x24] sm:$0xf0]  ;;  %v390_v58 = vld [vmem:[%s743_s1 + $0x20] sm:$0xf]  ;;  %v470_v59 = vld [vmem:[%s743_s1 + $0x28] sm:$0xf0]  ;;  %v383_v60 = vor.u32 %v469_v55, %v382_v54 }
   0xf   :  { %v387_v61 = vor.u32 %v468_v56, %v384_v57  ;;  %v391_v62 = vor.u32 %v470_v59, %v390_v58  ;;  %v370_v63 = vld [vmem:[%s743_s1] sm:$0xf]  ;;  %v466_v0 = vld [vmem:[%s743_s1 + $0x8] sm:$0xf0]  ;;  %v465_v1 = vld [vmem:[%s743_s1 + $0x4] sm:$0xf] }
  0x10   :  { %202 = vmatpush.bf16.msra.mxu0 %v419_v33  ;;  %v372_v2 = vld [vmem:[%s743_s1 + $0xc] sm:$0xf0]  ;;  %v378_v3 = vld [vmem:[%s743_s1 + $0x8] sm:$0xf]  ;;  %v467_v4 = vld [vmem:[%s743_s1 + $0x10] sm:$0xf0]  ;;  %v371_v5 = vor.u32 %v466_v0, %v370_v63 }
  0x11   :  { %216 = vmatpush.bf16.msra.mxu1 %v423_v34  ;;  %230 = vmatpush.bf16.msra.mxu2 %v427_v35  ;;  %v375_v6 = vor.u32 %v465_v1, %v372_v2  ;;  %v379_v7 = vor.u32 %v467_v4, %v378_v3  ;;  %v464_v8 = vld [vmem:[%s744_s0] sm:$0xff]  ;;  %v514_v9 = vmov -inf   ;;  %v515_v30 = vmov 0  }
  0x12   :  { %19 = vst.msk [vmem:[#allocation2] sm:$0xff] %vm18_vm0, %v514_v9  ;;  %v57_v10 = vld [vmem:[%s745_s2] sm:$0x7]  ;;  %492 = vset.pattern.permute.xlu1 %v515_v30  ;;  %493 = vset.pattern.permute.xlu0 %v515_v30  ;;  %v516_v31 = vmov 0.0  }
  0x13   :  { %20 = vst.msk [vmem:[#allocation2 + $0x8] sm:$0xff] %vm18_vm0, %v514_v9  ;;  %v59_v11 = vperm.slane %v57_v10, 0  ;;  %v60_v13 = vperm.slane %v57_v10, 1  ;;  %v61_v14 = vperm.slane %v57_v10, 2 }
  0x14   :  { %203 = vmatpush.bf16.msra.mxu0 %v407_v42  ;;  %21 = vst.msk [vmem:[#allocation3] sm:$0xff] %vm18_vm0, %v516_v31 }
  0x15   :  { %217 = vmatpush.bf16.msra.mxu1 %v411_v43  ;;  %231 = vmatpush.bf16.msra.mxu2 %v415_v44  ;;  %22 = vst.msk [vmem:[#allocation3 + $0x8] sm:$0xff] %vm18_vm0, %v516_v31 }
  0x18   :  { %204 = vmatpush.bf16.msra.mxu0 %v395_v51 }
  0x19   :  { %218 = vmatpush.bf16.msra.mxu1 %v399_v52  ;;  %232 = vmatpush.bf16.msra.mxu2 %v403_v53  ;;  %v252_v32 = vld [vmem:[#allocation2] sm:$0xff] }
  0x1a   :  { %v253_v36 = vld [vmem:[#allocation2 + $0x8] sm:$0xff] }
  0x1b   :  { %v264_v3 = vld [vmem:[#allocation3] sm:$0xff] }
  0x1c   :  { %205 = vmatpush.bf16.msra.mxu0 %v383_v60 }
  0x1d   :  { %219 = vmatpush.bf16.msra.mxu1 %v387_v61  ;;  %233 = vmatpush.bf16.msra.mxu2 %v391_v62 }
  0x20   :  { %206 = vmatpush.bf16.msra.mxu0 %v371_v5 }
  0x21   :  { %220 = vmatpush.bf16.msra.mxu1 %v375_v6  ;;  %234 = vmatpush.bf16.msra.mxu2 %v379_v7 }
  0x23   :  { %207 = vmatmul.bf16.vlgmr.msra.gmra.mxu0 %v464_v8 }
  0x24   :  { %221 = vmatmul.bf16.vlgmr.msra.gmra.mxu1 %v464_v8  ;;  %235 = vmatmul.bf16.vlgmr.msra.gmra.mxu2 %v464_v8  ;;  %v265_v8 = vld [vmem:[#allocation3 + $0x8] sm:$0xff] }
  0xa0   :  { %v208_v12 = vpop.f32.mrf.mxu0 }
  0xa1   :  { %v222_v15 = vpop.f32.mrf.mxu1  ;;  %v689_v16 = vadd.f32 %v208_v12, %v59_v11 }
  0xa2   :  { %v691_v18 = vadd.f32 %v222_v15, %v60_v13 }
  0xa7   :  { %v236_v17 = vpop.f32.mrf.mxu2 }
  0xa8   :  { %v693_v19 = vadd.f32 %v236_v17, %v61_v14  ;;  %v210_v22 = vpop.f32.mrf.mxu0 }
  0xa9   :  { %v224_v23 = vpop.f32.mrf.mxu1  ;;  %v698_v25 = vadd.f32 %v210_v22, %v59_v11 }
  0xaa   :  { %v254_v20 = vmax.f32 %v689_v16, %v693_v19  ;;  %v702_v27 = vadd.f32 %v224_v23, %v60_v13 }
  0xac   :  { %v255_v21 = vmax.f32 %v254_v20, %v691_v18 }
  0xae   :  { %256 = vmax.xlane.f32.xlu0 %v255_v21 }
  0xaf   :  { %v238_v24 = vpop.f32.mrf.mxu2 }
  0xb0   :  { %v700_v26 = vadd.f32 %v238_v24, %v61_v14 }
  0xb2   :  { %v258_v28 = vmax.f32 %v698_v25, %v700_v26 }
  0xb4   :  { %v259_v29 = vmax.f32 %v258_v28, %v702_v27 }
  0xb6   :  { %260 = vmax.xlane.f32.xlu0 %v259_v29 }
 0x121   :  { %v257_v33 = vpop.xlane.xlu0 %256 }
 0x122   :  { %v262_v34 = vmax.f32 %v252_v32, %v257_v33 }
 0x124   :  { %v266_v35 = vsub.f32 %v252_v32, %v262_v34  ;;  %315 = vst.msk [vmem:[#allocation2] sm:$0xff] %vm18_vm0, %v262_v34  ;;  %276 = vperm.xlu1 %492, %v262_v34  }
 0x126   :  { %v268_v0 = vmul.f32 1.442695, %v266_v35 }
 0x129   :  { %v261_v37 = vpop.xlane.xlu0 %260 }
 0x12a   :  { %v263_v38 = vmax.f32 %v253_v36, %v261_v37 }
 0x12b   :  { %v320_v17 = vld [vmem:[#allocation2] sm:$0xff] }
 0x12c   :  { %v267_v39 = vsub.f32 %v253_v36, %v263_v38  ;;  %316 = vst.msk [vmem:[#allocation2 + $0x8] sm:$0xff] %vm18_vm0, %v263_v38  ;;  %281 = vperm.xlu1 %492, %v263_v38  }
 0x12e   :  { %v270_v1 = vmul.f32 1.442695, %v267_v39 }
 0x133   :  { %v321_v23 = vld [vmem:[#allocation2 + $0x8] sm:$0xff] }
 0x196   :  { %v277_v40 = vpop.permute.xlu1 %276 }
 0x197   :  { %v284_v41 = vsub.f32 %v689_v16, %v277_v40  ;;  %v285_v42 = vsub.f32 %v691_v18, %v277_v40  ;;  %v286_v43 = vsub.f32 %v693_v19, %v277_v40 }
 0x199   :  { %v290_v44 = vmul.f32 1.442695, %v284_v41  ;;  %v292_v45 = vmul.f32 1.442695, %v285_v42  ;;  %v294_v46 = vmul.f32 1.442695, %v286_v43 }
 0x19b   :  { %494 = vpow2.f32 %v290_v44 }
 0x19c   :  { %496 = vpow2.f32 %v292_v45 }
 0x19d   :  { %498 = vpow2.f32 %v294_v46 }
 0x19e   :  { %v282_v47 = vpop.permute.xlu1 %281 }
 0x19f   :  { %v287_v48 = vsub.f32 %v698_v25, %v282_v47  ;;  %v288_v49 = vsub.f32 %v702_v27, %v282_v47  ;;  %v289_v50 = vsub.f32 %v700_v26, %v282_v47 }
 0x1a1   :  { %v495_v51 = vpop.eup %494  ;;  %v296_v52 = vmul.f32 1.442695, %v287_v48  ;;  %v298_v53 = vmul.f32 1.442695, %v288_v49  ;;  %v300_v55 = vmul.f32 1.442695, %v289_v50 }
 0x1a2   :  { %v497_v54 = vpop.eup %496 }
 0x1a3   :  { %500 = vpow2.f32 %v296_v52  ;;  %v302_v56 = vadd.f32 %v497_v54, %v495_v51  ;;  %v499_v57 = vpop.eup %498 }
 0x1a4   :  { %502 = vpow2.f32 %v298_v53 }
 0x1a5   :  { %v303_v58 = vadd.f32 %v499_v57, %v302_v56  ;;  %504 = vpow2.f32 %v300_v55 }
 0x1a6   :  { %506 = vpow2.f32 %v268_v0 }
 0x1a7   :  { %304 = vadd.xlane.f32.xlu2 %v303_v58  ;;  %508 = vpow2.f32 %v270_v1 }
 0x1a9   :  { %v501_v59 = vpop.eup %500 }
 0x1aa   :  { %v503_v60 = vpop.eup %502 }
 0x1ab   :  { %v306_v61 = vadd.f32 %v503_v60, %v501_v59  ;;  %v505_v62 = vpop.eup %504 }
 0x1ac   :  { %v507_v2 = vpop.eup %506 }
 0x1ad   :  { %v307_v63 = vadd.f32 %v505_v62, %v306_v61  ;;  %v272_v4 = vmul.f32 %v507_v2, %v264_v3  ;;  %v509_v7 = vpop.eup %508 }
 0x1ae   :  { %v273_v9 = vmul.f32 %v509_v7, %v265_v8 }
 0x1af   :  { %308 = vadd.xlane.f32.xlu2 %v307_v63 }
 0x21a   :  { %v305_v5 = vpop.xlane.xlu2 %304 }
 0x21b   :  { %v310_v6 = vadd.f32 %v305_v5, %v272_v4 }
 0x21d   :  { %313 = vst.msk [vmem:[#allocation3] sm:$0xff] %vm18_vm0, %v310_v6 }
 0x222   :  { %v309_v10 = vpop.xlane.xlu2 %308 }
 0x223   :  { %v311_v11 = vadd.f32 %v309_v10, %v273_v9 }
 0x224   :  { %v322_v12 = vld [vmem:[#allocation3] sm:$0xff] }
 0x225   :  { %314 = vst.msk [vmem:[#allocation3 + $0x8] sm:$0xff] %vm18_vm0, %v311_v11  ;;  %510 = vlog2.f32 %v322_v12 }
 0x22b   :  { %v511_v13 = vpop.eup %510 }
 0x22c   :  { %v325_v14 = vmul.f32 0.6931472, %v511_v13  ;;  %v323_v15 = vld [vmem:[#allocation3 + $0x8] sm:$0xff] }
 0x22d   :  { %512 = vlog2.f32 %v323_v15 }
 0x22e   :  { %v328_v20 = vadd.f32 %v325_v14, %v320_v17 }
 0x230   :  { %338 = vperm.xlu0 %493, %v328_v20  }
 0x233   :  { %v513_v21 = vpop.eup %512 }
 0x234   :  { %v327_v22 = vmul.f32 0.6931472, %v513_v21 }
 0x236   :  { %v329_v24 = vadd.f32 %v327_v22, %v321_v23 }
 0x238   :  { %343 = vperm.xlu1 %492, %v329_v24  }
 0x2a2   :  { %v339_v28 = vpop.permute.xlu0 %338 }
 0x2a3   :  { %v346_v29 = vsub.f32 %v689_v16, %v339_v28  ;;  %v347_v30 = vsub.f32 %v691_v18, %v339_v28  ;;  %v348_v31 = vsub.f32 %v693_v19, %v339_v28 }
 0x2a5   :  { %352 = vst [vmem:[%s746_s3] sm:$0xff] %v346_v29 }
 0x2a6   :  { %353 = vst [vmem:[%s746_s3 + $0x8] sm:$0xff] %v347_v30 }
 0x2a7   :  { %354 = vst [vmem:[%s746_s3 + $0x10] sm:$0xff] %v348_v31 }
 0x2aa   :  { %v344_v32 = vpop.permute.xlu1 %343 }
 0x2ab   :  { %v349_v33 = vsub.f32 %v698_v25, %v344_v32  ;;  %v350_v16 = vsub.f32 %v702_v27, %v344_v32  ;;  %v351_v18 = vsub.f32 %v700_v26, %v344_v32 }
 0x2ad   :  { %355 = vst [vmem:[%s746_s3 + $0x18] sm:$0xff] %v349_v33 }
 0x2ae   :  { %356 = vst [vmem:[%s746_s3 + $0x20] sm:$0xff] %v350_v16 }
 0x2af   :  { %357 = vst [vmem:[%s746_s3 + $0x28] sm:$0xff] %v351_v18 }

</bundles_post_ra>
